<compile_context>
chip_gen: v7x
topology: tpu7x:2x2x1
jax: 0.10.0
libtpu: 0.0.40
codegen_flags: <defaults>
</compile_context>

<pallas_src>
import jax
import jax.numpy as jnp
from jax.experimental import pallas as pl
from jax.experimental.pallas import tpu as pltpu

LANE = 128  # TPU lane width; hidden dims (128/64/32) are padded to this.


def _round_up(x: int, m: int) -> int:
    return (x + m - 1) // m * m


def _mlp_kernel(x_ref, w1_ref, w23_ref, b123_ref, w4_ref, b4_ref, o_ref):
    """Fused 4-layer MLP on one (TM, D0) batch tile.

    Matmul inputs are bf16 (MXU bf16 path); accumulation and the bias/ReLU
    epilogue are f32.  Zero-padded weight rows/cols and biases make the
    padding mathematically exact.
    """
    xb = x_ref[...].astype(jnp.bfloat16)          # VPU cast, hidden under DMA
    bs = b123_ref[...]                            # (3, 128) f32

    # Layer 1: (TM, D0) @ (D0, 128)
    h = jnp.dot(xb, w1_ref[...], preferred_element_type=jnp.float32)
    h = jnp.maximum(h + bs[0:1], 0.0)

    # Layer 2: (TM, 128) @ (128, 128)   (valid cols 0:64, rest exact zeros)
    h = jnp.dot(h.astype(jnp.bfloat16), w23_ref[0],
                preferred_element_type=jnp.float32)
    h = jnp.maximum(h + bs[1:2], 0.0)

    # Layer 3: (TM, 128) @ (128, 128)   (valid cols 0:32)
    h = jnp.dot(h.astype(jnp.bfloat16), w23_ref[1],
                preferred_element_type=jnp.float32)
    h = jnp.maximum(h + bs[2:3], 0.0)

    # Layer 4 (no ReLU): (TM, 128) @ (128, latent) -> exact-width output
    h = jnp.dot(h.astype(jnp.bfloat16), w4_ref[...],
                preferred_element_type=jnp.float32)
    o_ref[...] = (h + b4_ref[...]).astype(o_ref.dtype)


def _pad_wt(w, rows: int, cols: int):
    """PyTorch (out,in) weight -> transposed, zero-padded, bf16 (rows, cols)."""
    wt = jnp.asarray(w, jnp.float32).T
    r, c = wt.shape
    return jnp.pad(wt, ((0, rows - r), (0, cols - c))).astype(jnp.bfloat16)


def _pad_bias(b, cols: int):
    b = jnp.asarray(b, jnp.float32)
    return jnp.pad(b, (0, cols - b.shape[0]))


def _choose_tm(batch: int, d0: int, latent: int) -> int:
    """Batch-tile rows.

    Single tile for B <= 2048 (grid steps are pure overhead on 1-TC chips for
    a kernel this small); 2048-row tiles above that (>= 2 tiles lets v7x's
    two TensorCores shard the 'parallel' axis).  Capped so the double-buffered
    x + out blocks stay around <= 8 MiB of VMEM even for very wide inputs.
    """
    row_bytes = 4 * (d0 + latent)
    cap = max(8, ((4 * 1024 * 1024) // max(row_bytes, 1)) // 8 * 8)
    tm = batch if batch <= 2048 else 2048
    return min(tm, cap)


@jax.jit
def simple_acg_encoder(x, w1, b1, w2, b2, w3, b3, w4, b4):
    """Forward pass of SimpleAcgEncoder.

    x        : (B, D0) float32
    w{1..4}  : PyTorch-layout (out_features, in_features) float32 weights
    b{1..4}  : (out_features,) float32 biases
    returns  : (B, latent) float32
    """
    B, D0 = x.shape
    latent = w4.shape[0]

    # ---- packed, lane-dense bf16 parameters (zero padding is exact) --------
    w1p = _pad_wt(w1, D0, LANE)                              # (D0, 128)
    w23 = jnp.stack([_pad_wt(w2, LANE, LANE),
                     _pad_wt(w3, LANE, LANE)])               # (2, 128, 128)
    w4p = _pad_wt(w4, LANE, latent)                          # (128, latent)
    b123 = jnp.stack([_pad_bias(b1, LANE),
                      _pad_bias(b2, LANE),
                      _pad_bias(b3, LANE)])                  # (3, 128) f32
    b4p = jnp.asarray(b4, jnp.float32).reshape(1, latent)    # (1, latent)

    # ---- batch tiling (ragged last tile; OOB rows discarded on writeback) --
    TM = _choose_tm(B, D0, latent)
    n_tiles = pl.cdiv(B, TM)

    x = jnp.asarray(x, jnp.float32)

    in_specs = [
        pl.BlockSpec((TM, D0), lambda i: (i, 0)),            # x: tiled
        pl.BlockSpec((D0, LANE), lambda i: (0, 0)),          # params: resident
        pl.BlockSpec((2, LANE, LANE), lambda i: (0, 0, 0)),
        pl.BlockSpec((3, LANE), lambda i: (0, 0)),
        pl.BlockSpec((LANE, latent), lambda i: (0, 0)),
        pl.BlockSpec((1, latent), lambda i: (0, 0)),
    ]
    out_spec = pl.BlockSpec((TM, latent), lambda i: (i, 0))

    flops = 2 * B * (D0 * LANE + 2 * LANE * LANE + LANE * latent)
    bytes_accessed = (x.size * 4
                      + (w1p.size + w23.size + w4p.size) * 2
                      + (b123.size + b4p.size) * 4
                      + B * latent * 4)

    return pl.pallas_call(
        _mlp_kernel,
        out_shape=jax.ShapeDtypeStruct((B, latent), jnp.float32),
        grid_spec=pltpu.PrefetchScalarGridSpec(
            num_scalar_prefetch=0,
            grid=(n_tiles,),
            in_specs=in_specs,
            out_specs=out_spec,
        ),
        compiler_params=pltpu.CompilerParams(
            dimension_semantics=("parallel",),   # megacore sharding on v7x
            vmem_limit_bytes=32 * 1024 * 1024,   # plenty; fits every gen
        ),
        cost_estimate=pl.CostEstimate(flops=flops, transcendentals=0,
                                      bytes_accessed=bytes_accessed),
    )(x, w1p, w23, b123, w4p, b4p)


def _reference(x, params):
    """Pure-JAX mirror of the kernel's precision strategy (bf16 matmuls,
    f32 accumulate + epilogue)."""
    h = jnp.asarray(x, jnp.float32)
    n = len(params)
    for i, (w, b) in enumerate(params):
        h = jnp.dot(h.astype(jnp.bfloat16),
                    jnp.asarray(w, jnp.float32).T.astype(jnp.bfloat16),
                    preferred_element_type=jnp.float32) + jnp.asarray(b, jnp.float32)
        if i < n - 1:
            h = jnp.maximum(h, 0.0)
    return h


if __name__ == "__main__":
    B, D0, latent = 512, 100, 16   # small; single batch tile, odd input width

    key = jax.random.PRNGKey(0)
    ks = jax.random.split(key, 9)
    x = jax.random.normal(ks[0], (B, D0), dtype=jnp.float32)

    def init_linear(kw, kb, fan_in, fan_out):
        bound = 1.0 / (fan_in ** 0.5)
        w = jax.random.uniform(kw, (fan_out, fan_in), jnp.float32, -bound, bound)
        b = jax.random.uniform(kb, (fan_out,), jnp.float32, -bound, bound)
        return w, b

    w1, b1 = init_linear(ks[1], ks[2], D0, 128)
    w2, b2 = init_linear(ks[3], ks[4], 128, 64)
    w3, b3 = init_linear(ks[5], ks[6], 64, 32)
    w4, b4 = init_linear(ks[7], ks[8], 32, latent)

    out = simple_acg_encoder(x, w1, b1, w2, b2, w3, b3, w4, b4)
    out = jax.block_until_ready(out)

    ref = _reference(x, [(w1, b1), (w2, b2), (w3, b3), (w4, b4)])

    assert out.shape == (B, latent)
    if bool(jnp.allclose(out, ref, atol=1e-2, rtol=1e-2)):
        print("KERNEL_OK")
</pallas_src>

<mosaic_0001>
module attributes {stable_mosaic.version = 11 : i64} {
  func.func @_mlp_kernel(%arg0: i32, %arg1: memref<512x100xf32, #tpu.memory_space<vmem>>, %arg2: memref<100x128xbf16, #tpu.memory_space<vmem>>, %arg3: memref<2x128x128xbf16, #tpu.memory_space<vmem>>, %arg4: memref<3x128xf32, #tpu.memory_space<vmem>>, %arg5: memref<128x16xbf16, #tpu.memory_space<vmem>>, %arg6: memref<1x16xf32, #tpu.memory_space<vmem>>, %arg7: memref<512x16xf32, #tpu.memory_space<vmem>>) attributes {dimension_semantics = [#tpu.dimension_semantics<parallel>], iteration_bounds = array<i64: 1>, scalar_prefetch = 0 : i64, scratch_operands = 0 : i64, tpu.core_type = #tpu.core_type<tc>, window_params = [{transform_indices = @transform_0, window_bounds = array<i64: 512, 100>}, {pipeline_mode = #tpu.pipeline_mode<synchronous>, transform_indices = @transform_1, window_bounds = array<i64: 100, 128>}, {pipeline_mode = #tpu.pipeline_mode<synchronous>, transform_indices = @transform_2, window_bounds = array<i64: 2, 128, 128>}, {pipeline_mode = #tpu.pipeline_mode<synchronous>, transform_indices = @transform_3, window_bounds = array<i64: 3, 128>}, {pipeline_mode = #tpu.pipeline_mode<synchronous>, transform_indices = @transform_4, window_bounds = array<i64: 128, 16>}, {pipeline_mode = #tpu.pipeline_mode<synchronous>, transform_indices = @transform_5, window_bounds = array<i64: 1, 16>}, {transform_indices = @transform_6, window_bounds = array<i64: 512, 16>}]} {
    %c0 = arith.constant 0 : index
    %c0_0 = arith.constant 0 : index
    %0 = vector.load %arg1[%c0, %c0_0] : memref<512x100xf32, #tpu.memory_space<vmem>>, vector<512x100xf32>
    %1 = arith.truncf %0 : vector<512x100xf32> to vector<512x100xbf16>
    %c0_1 = arith.constant 0 : index
    %c0_2 = arith.constant 0 : index
    %2 = vector.load %arg4[%c0_1, %c0_2] : memref<3x128xf32, #tpu.memory_space<vmem>>, vector<3x128xf32>
    %c0_3 = arith.constant 0 : index
    %c0_4 = arith.constant 0 : index
    %3 = vector.load %arg2[%c0_3, %c0_4] : memref<100x128xbf16, #tpu.memory_space<vmem>>, vector<100x128xbf16>
    %cst = arith.constant dense<0.000000e+00> : vector<512x128xf32>
    %4 = tpu.matmul %1, %3, %cst {dimension_numbers = #tpu.dot_dimension_numbers<[1], [0], [0], [1], [0, 0, 1, 1], [], []>} : vector<512x100xbf16>, vector<100x128xbf16>, vector<512x128xf32> -> vector<512x128xf32>
    %5 = vector.extract_strided_slice %2 {offsets = [0, 0], sizes = [1, 128], strides = [1, 1]} : vector<3x128xf32> to vector<1x128xf32>
    %6 = vector.broadcast %5 : vector<1x128xf32> to vector<512x128xf32>
    %7 = arith.addf %4, %6 : vector<512x128xf32>
    %cst_5 = arith.constant 0.000000e+00 : f32
    %8 = vector.broadcast %cst_5 : f32 to vector<512x128xf32>
    %9 = arith.maximumf %7, %8 : vector<512x128xf32>
    %10 = arith.truncf %9 : vector<512x128xf32> to vector<512x128xbf16>
    %c0_6 = arith.constant 0 : index
    %c0_7 = arith.constant 0 : index
    %c0_8 = arith.constant 0 : index
    %11 = vector.load %arg3[%c0_6, %c0_7, %c0_8] : memref<2x128x128xbf16, #tpu.memory_space<vmem>>, vector<1x128x128xbf16>
    %12 = vector.shape_cast %11 : vector<1x128x128xbf16> to vector<128x128xbf16>
    %cst_9 = arith.constant dense<0.000000e+00> : vector<512x128xf32>
    %13 = tpu.matmul %10, %12, %cst_9 {dimension_numbers = #tpu.dot_dimension_numbers<[1], [0], [0], [1], [0, 0, 1, 1], [], []>} : vector<512x128xbf16>, vector<128x128xbf16>, vector<512x128xf32> -> vector<512x128xf32>
    %14 = vector.extract_strided_slice %2 {offsets = [1, 0], sizes = [1, 128], strides = [1, 1]} : vector<3x128xf32> to vector<1x128xf32>
    %15 = vector.broadcast %14 : vector<1x128xf32> to vector<512x128xf32>
    %16 = arith.addf %13, %15 : vector<512x128xf32>
    %cst_10 = arith.constant 0.000000e+00 : f32
    %17 = vector.broadcast %cst_10 : f32 to vector<512x128xf32>
    %18 = arith.maximumf %16, %17 : vector<512x128xf32>
    %19 = arith.truncf %18 : vector<512x128xf32> to vector<512x128xbf16>
    %c1 = arith.constant 1 : index
    %c0_11 = arith.constant 0 : index
    %c0_12 = arith.constant 0 : index
    %20 = vector.load %arg3[%c1, %c0_11, %c0_12] : memref<2x128x128xbf16, #tpu.memory_space<vmem>>, vector<1x128x128xbf16>
    %21 = vector.shape_cast %20 : vector<1x128x128xbf16> to vector<128x128xbf16>
    %cst_13 = arith.constant dense<0.000000e+00> : vector<512x128xf32>
    %22 = tpu.matmul %19, %21, %cst_13 {dimension_numbers = #tpu.dot_dimension_numbers<[1], [0], [0], [1], [0, 0, 1, 1], [], []>} : vector<512x128xbf16>, vector<128x128xbf16>, vector<512x128xf32> -> vector<512x128xf32>
    %23 = vector.extract_strided_slice %2 {offsets = [2, 0], sizes = [1, 128], strides = [1, 1]} : vector<3x128xf32> to vector<1x128xf32>
    %24 = vector.broadcast %23 : vector<1x128xf32> to vector<512x128xf32>
    %25 = arith.addf %22, %24 : vector<512x128xf32>
    %cst_14 = arith.constant 0.000000e+00 : f32
    %26 = vector.broadcast %cst_14 : f32 to vector<512x128xf32>
    %27 = arith.maximumf %25, %26 : vector<512x128xf32>
    %28 = arith.truncf %27 : vector<512x128xf32> to vector<512x128xbf16>
    %c0_15 = arith.constant 0 : index
    %c0_16 = arith.constant 0 : index
    %29 = vector.load %arg5[%c0_15, %c0_16] : memref<128x16xbf16, #tpu.memory_space<vmem>>, vector<128x16xbf16>
    %cst_17 = arith.constant dense<0.000000e+00> : vector<512x16xf32>
    %30 = tpu.matmul %28, %29, %cst_17 {dimension_numbers = #tpu.dot_dimension_numbers<[1], [0], [0], [1], [0, 0, 1, 1], [], []>} : vector<512x128xbf16>, vector<128x16xbf16>, vector<512x16xf32> -> vector<512x16xf32>
    %c0_18 = arith.constant 0 : index
    %c0_19 = arith.constant 0 : index
    %31 = vector.load %arg6[%c0_18, %c0_19] : memref<1x16xf32, #tpu.memory_space<vmem>>, vector<1x16xf32>
    %32 = vector.broadcast %31 : vector<1x16xf32> to vector<512x16xf32>
    %33 = arith.addf %30, %32 : vector<512x16xf32>
    %c0_20 = arith.constant 0 : index
    %c0_21 = arith.constant 0 : index
    %34 = vector.load %arg7[%c0_20, %c0_21] : memref<512x16xf32, #tpu.memory_space<vmem>>, vector<512x16xf32>
    tpu.vector_store %arg7[%c0_20, %c0_21], %33 {strides = array<i32>} : memref<512x16xf32, #tpu.memory_space<vmem>>, vector<512x16xf32>,
    return
  }
  func.func @transform_0(%arg0: i32) -> (i32, i32) {
    %c0_i32 = arith.constant 0 : i32
    %c0_i32_0 = arith.constant 0 : i32
    return %arg0, %c0_i32 : i32, i32
  }
  func.func @transform_1(%arg0: i32) -> (i32, i32) {
    %c0_i32 = arith.constant 0 : i32
    %c0_i32_0 = arith.constant 0 : i32
    %c0_i32_1 = arith.constant 0 : i32
    return %c0_i32, %c0_i32_0 : i32, i32
  }
  func.func @transform_2(%arg0: i32) -> (i32, i32, i32) {
    %c0_i32 = arith.constant 0 : i32
    %c0_i32_0 = arith.constant 0 : i32
    %c0_i32_1 = arith.constant 0 : i32
    %c0_i32_2 = arith.constant 0 : i32
    return %c0_i32, %c0_i32_0, %c0_i32_1 : i32, i32, i32
  }
  func.func @transform_3(%arg0: i32) -> (i32, i32) {
    %c0_i32 = arith.constant 0 : i32
    %c0_i32_0 = arith.constant 0 : i32
    %c0_i32_1 = arith.constant 0 : i32
    return %c0_i32, %c0_i32_0 : i32, i32
  }
  func.func @transform_4(%arg0: i32) -> (i32, i32) {
    %c0_i32 = arith.constant 0 : i32
    %c0_i32_0 = arith.constant 0 : i32
    %c0_i32_1 = arith.constant 0 : i32
    return %c0_i32, %c0_i32_0 : i32, i32
  }
  func.func @transform_5(%arg0: i32) -> (i32, i32) {
    %c0_i32 = arith.constant 0 : i32
    %c0_i32_0 = arith.constant 0 : i32
    %c0_i32_1 = arith.constant 0 : i32
    return %c0_i32, %c0_i32_0 : i32, i32
  }
  func.func @transform_6(%arg0: i32) -> (i32, i32) {
    %c0_i32 = arith.constant 0 : i32
    %c0_i32_0 = arith.constant 0 : i32
    return %arg0, %c0_i32 : i32, i32
  }
}

</mosaic_0001>

<bundles_post_ra>
// kernel: simple_acg_encoder.1
= control target key start
LH: loop header
LB: loop body
LE: loop exit
PB: predicated region body
PF: predicated region fallthrough
CT: control target
= control target key end

     0   :  { %vm177_vm0 = vcmask 818176   ;;  %vm274_vm1 = vcmask 1041408   ;;  %vm1930_vm2 = vcmask 130048   ;;  %s3479_s1 = inlined_call_operand.vmem [shape: bf16[100,128], index: 1, kind: input, shape index: {}]   ;;  %s3480_s0 = inlined_call_operand.vmem [shape: f32[512,100], index: 0, kind: input, shape index: {}]   ;;  %s3481_s2 = inlined_call_operand.vmem [shape: bf16[2,128,128], index: 2, kind: input, shape index: {}]   ;;  %s3482_s3 = inlined_call_operand.vmem [shape: f32[3,128], index: 3, kind: input, shape index: {}]   ;;  %s3483_s4 = inlined_call_operand.vmem [shape: bf16[128,16], index: 4, kind: input, shape index: {}]   ;;  %s3484_s5 = inlined_call_operand.vmem [shape: f32[1,16], index: 5, kind: input, shape index: {}]   ;;  %s3485_s6 = inlined_call_operand.vmem [shape: f32[512,16], index: 6, kind: output, shape index: {}]  }
   0x1   :  { %v2557_v0 = vld [vmem:[%s3479_s1] sm:$0xff]   ;;  %v2558_v1 = vld [vmem:[%s3479_s1 + $0x8] sm:$0xff]   ;;  %v2559_v2 = vld [vmem:[%s3479_s1 + $0x10] sm:$0xff]  }
   0x2   :  { %2238 = vmatprep.subr.bf16.mxu0 %v2557_v0  ;;  %v24_v3 = vld [vmem:[%s3480_s0] sm:$0xff]  ;;  %v25_v4 = vld [vmem:[%s3480_s0 + $0x8] sm:$0xff]  ;;  %v2560_v5 = vld [vmem:[%s3479_s1 + $0x18] sm:$0xff]  }
   0x3   :  { %2239 = vmatpush3.bf16.msra.mxu0 %v2557_v0  ;;  %v88_v6 = vpack.c.bf16 %v25_v4, %v24_v3  ;;  %v2561_v7 = vld [vmem:[%s3479_s1 + $0x20] sm:$0xff]   ;;  %v2562_v8 = vld [vmem:[%s3479_s1 + $0x28] sm:$0xff]   ;;  %v2563_v9 = vld [vmem:[%s3479_s1 + $0x30] ss:$0 sps:$4 sm:$0x33]  }
   0x4   :  { %2240 = vmatprep.subr.bf16.mxu0 %v2558_v1  ;;  %v26_v10 = vld [vmem:[%s3480_s0 + $0x10] sm:$0xff]  ;;  %v27_v11 = vld [vmem:[%s3480_s0 + $0x18] sm:$0xff]  ;;  %v276_v12 = vsel %vm274_vm1, %v2563_v9, 0  ;;  %v28_v13 = vld [vmem:[%s3480_s0 + $0x20] sm:$0xff] }
   0x5   :  { %2252 = vmatprep.mubr.msk.bf16.mxu0 %vm177_vm0, %v88_v6  ;;  %v29_v14 = vld [vmem:[%s3480_s0 + $0x28] sm:$0xff]  ;;  %v89_v15 = vpack.c.bf16 %v27_v11, %v26_v10  ;;  %v2564_v17 = vld [vmem:[%s3481_s2] sm:$0xff]   ;;  %v30_v18 = vld [vmem:[%s3480_s0 + $0x30] sm:$0xff] }
   0x6   :  { %v90_v16 = vpack.c.bf16 %v29_v14, %v28_v13  ;;  %v31_v19 = vld [vmem:[%s3480_s0 + $0x38] sm:$0xff]  ;;  %v2565_v20 = vld [vmem:[%s3481_s2 + $0x8] sm:$0xff]   ;;  %v32_v21 = vld [vmem:[%s3480_s0 + $0x40] sm:$0xff]  ;;  %2316 = vmatprep.subr.bf16.mxu1 %v2564_v17 }
   0x7   :  { %2241 = vmatpush3.bf16.msra.mxu0 %v2558_v1  ;;  %v33_v22 = vld [vmem:[%s3480_s0 + $0x48] sm:$0xff]  ;;  %2317 = vmatpush3.bf16.msra.mxu1 %v2564_v17  ;;  %v2566_v23 = vld [vmem:[%s3481_s2 + $0x10] sm:$0xff]   ;;  %v91_v24 = vpack.c.bf16 %v31_v19, %v30_v18  ;;  %v2567_v25 = vld [vmem:[%s3481_s2 + $0x18] sm:$0xff]  }
   0x8   :  { %2242 = vmatprep.subr.bf16.mxu0 %v2559_v2  ;;  %2318 = vmatprep.subr.bf16.mxu1 %v2565_v20  ;;  %v92_v26 = vpack.c.bf16 %v33_v22, %v32_v21  ;;  %v34_v27 = vld [vmem:[%s3480_s0 + $0x50] sm:$0xff]  ;;  %v35_v28 = vld [vmem:[%s3480_s0 + $0x58] sm:$0xff]  ;;  %v36_v29 = vld [vmem:[%s3480_s0 + $0x60] sm:$0xff] }
   0x9   :  { %v37_v30 = vld [vmem:[%s3480_s0 + $0x68] sm:$0xff]  ;;  %v2568_v31 = vld [vmem:[%s3481_s2 + $0x20] sm:$0xff]   ;;  %v93_v32 = vpack.c.bf16 %v35_v28, %v34_v27  ;;  %v38_v35 = vld [vmem:[%s3480_s0 + $0x70] sm:$0xff] }
   0xa   :  { %v94_v33 = vpack.c.bf16 %v37_v30, %v36_v29  ;;  %v2569_v34 = vld [vmem:[%s3481_s2 + $0x28] sm:$0xff]   ;;  %v39_v36 = vld [vmem:[%s3480_s0 + $0x78] sm:$0xff]  ;;  %v40_v37 = vld [vmem:[%s3480_s0 + $0x80] sm:$0xff] }
   0xb   :  { %2243 = vmatpush3.bf16.msra.mxu0 %v2559_v2  ;;  %2319 = vmatpush3.bf16.msra.mxu1 %v2565_v20  ;;  %v41_v38 = vld [vmem:[%s3480_s0 + $0x88] sm:$0xff]  ;;  %v95_v39 = vpack.c.bf16 %v39_v36, %v38_v35  ;;  %v42_v41 = vld [vmem:[%s3480_s0 + $0x90] sm:$0xff]  ;;  %v43_v42 = vld [vmem:[%s3480_s0 + $0x98] sm:$0xff] }
   0xc   :  { %2244 = vmatprep.subr.bf16.mxu0 %v2560_v5  ;;  %2320 = vmatprep.subr.bf16.mxu1 %v2566_v23  ;;  %v96_v40 = vpack.c.bf16 %v41_v38, %v40_v37  ;;  %v44_v43 = vld [vmem:[%s3480_s0 + $0xa0] sm:$0xff]  ;;  %v45_v44 = vld [vmem:[%s3480_s0 + $0xa8] sm:$0xff]  ;;  %v97_v45 = vpack.c.bf16 %v43_v42, %v42_v41  ;;  %v46_v47 = vld [vmem:[%s3480_s0 + $0xb0] sm:$0xff] }
   0xd   :  { %v98_v46 = vpack.c.bf16 %v45_v44, %v44_v43  ;;  %v47_v48 = vld [vmem:[%s3480_s0 + $0xb8] sm:$0xff]  ;;  %v48_v49 = vld [vmem:[%s3480_s0 + $0xc0] sm:$0xff]  ;;  %v49_v50 = vld [vmem:[%s3480_s0 + $0xc8] sm:$0xff] }
   0xe   :  { %v99_v51 = vpack.c.bf16 %v47_v48, %v46_v47  ;;  %v100_v52 = vpack.c.bf16 %v49_v50, %v48_v49  ;;  %v50_v53 = vld [vmem:[%s3480_s0 + $0xd0] sm:$0xff]  ;;  %v51_v54 = vld [vmem:[%s3480_s0 + $0xd8] sm:$0xff]  ;;  %v52_v55 = vld [vmem:[%s3480_s0 + $0xe0] sm:$0xff]  ;;  %v134_v49 = vlaneseq }
   0xf   :  { %2245 = vmatpush3.bf16.msra.mxu0 %v2560_v5  ;;  %2321 = vmatpush3.bf16.msra.mxu1 %v2566_v23  ;;  %v53_v56 = vld [vmem:[%s3480_s0 + $0xe8] sm:$0xff]  ;;  %v101_v57 = vpack.c.bf16 %v51_v54, %v50_v53  ;;  %v54_v59 = vld [vmem:[%s3480_s0 + $0xf0] sm:$0xff]  ;;  %v55_v60 = vld [vmem:[%s3480_s0 + $0xf8] sm:$0xff] }
  0x10   :  { %2246 = vmatprep.subr.bf16.mxu0 %v2561_v7  ;;  %2322 = vmatprep.subr.bf16.mxu1 %v2567_v25  ;;  %v102_v58 = vpack.c.bf16 %v53_v56, %v52_v55  ;;  %v56_v61 = vld [vmem:[%s3480_s0 + $0x100] sm:$0xff]  ;;  %v57_v62 = vld [vmem:[%s3480_s0 + $0x108] sm:$0xff]  ;;  %v103_v63 = vpack.c.bf16 %v55_v60, %v54_v59  ;;  %v58_v1 = vld [vmem:[%s3480_s0 + $0x110] sm:$0xff]  ;;  %v2896_v50 = vshrl.u32 %v134_v49, 7 }
  0x11   :  { %v104_v0 = vpack.c.bf16 %v57_v62, %v56_v61  ;;  %v59_v2 = vld [vmem:[%s3480_s0 + $0x118] sm:$0xff]  ;;  %v60_v3 = vld [vmem:[%s3480_s0 + $0x120] sm:$0xff]  ;;  %v61_v4 = vld [vmem:[%s3480_s0 + $0x128] sm:$0xff] }
  0x12   :  { %v105_v5 = vpack.c.bf16 %v59_v2, %v58_v1  ;;  %v106_v6 = vpack.c.bf16 %v61_v4, %v60_v3  ;;  %v65_v10 = vld [vmem:[%s3480_s0 + $0x148] sm:$0xff]  ;;  %v66_v13 = vld [vmem:[%s3480_s0 + $0x150] sm:$0xff]  ;;  %v67_v14 = vld [vmem:[%s3480_s0 + $0x158] sm:$0xff] }
  0x13   :  { %2247 = vmatpush3.bf16.msra.mxu0 %v2561_v7  ;;  %2323 = vmatpush3.bf16.msra.mxu1 %v2567_v25  ;;  %v62_v7 = vld [vmem:[%s3480_s0 + $0x130] sm:$0xff]  ;;  %v109_v17 = vpack.c.bf16 %v67_v14, %v66_v13  ;;  %v71_v20 = vld [vmem:[%s3480_s0 + $0x178] sm:$0xff]  ;;  %v72_v21 = vld [vmem:[%s3480_s0 + $0x180] sm:$0xff] }
  0x14   :  { %2248 = vmatprep.subr.bf16.mxu0 %v2562_v8  ;;  %2324 = vmatprep.subr.bf16.mxu1 %v2568_v31  ;;  %v70_v19 = vld [vmem:[%s3480_s0 + $0x170] sm:$0xff]  ;;  %v73_v22 = vld [vmem:[%s3480_s0 + $0x188] sm:$0xff]  ;;  %v75_v28 = vld [vmem:[%s3480_s0 + $0x198] sm:$0xff] }
  0x15   :  { %v111_v23 = vpack.c.bf16 %v71_v20, %v70_v19  ;;  %v112_v25 = vpack.c.bf16 %v73_v22, %v72_v21  ;;  %v74_v27 = vld [vmem:[%s3480_s0 + $0x190] sm:$0xff]  ;;  %v76_v29 = vld [vmem:[%s3480_s0 + $0x1a0] sm:$0xff]  ;;  %v77_v30 = vld [vmem:[%s3480_s0 + $0x1a8] sm:$0xff] }
  0x16   :  { %v80_v35 = vld [vmem:[%s3480_s0 + $0x1c0] sm:$0xff]  ;;  %v81_v36 = vld [vmem:[%s3480_s0 + $0x1c8] sm:$0xff]  ;;  %v2574_v62 = vld [vmem:[%s3481_s2 + $0x50] sm:$0xff]  }
  0x17   :  { %2249 = vmatpush3.bf16.msra.mxu0 %v2562_v8  ;;  %2325 = vmatpush3.bf16.msra.mxu1 %v2568_v31  ;;  %v63_v8 = vld [vmem:[%s3480_s0 + $0x138] sm:$0xff]  ;;  %v113_v31 = vpack.c.bf16 %v75_v28, %v74_v27  ;;  %v116_v38 = vpack.c.bf16 %v81_v36, %v80_v35  ;;  %v84_v41 = vld [vmem:[%s3480_s0 + $0x1e0] sm:$0xff]  ;;  %v85_v42 = vld [vmem:[%s3480_s0 + $0x1e8] sm:$0xff] }
  0x18   :  { %2556 = vmatprep.subr.msk.bf16.mxu0 %vm274_vm1, %v2563_v9  ;;  %2326 = vmatprep.subr.bf16.mxu1 %v2569_v34  ;;  %v64_v9 = vld [vmem:[%s3480_s0 + $0x140] sm:$0xff]  ;;  %v107_v11 = vpack.c.bf16 %v63_v8, %v62_v7  ;;  %v118_v44 = vpack.c.bf16 %v85_v42, %v84_v41  ;;  %v2573_v53 = vld [vmem:[%s3481_s2 + $0x48] sm:$0xff]   ;;  %v2578_v22 = vld [vmem:[%s3481_s2 + $0x70] sm:$0xff]  }
  0x19   :  { %v2572_v48 = vld [vmem:[%s3481_s2 + $0x40] sm:$0xff]  }
  0x1b   :  { %2251 = vmatpush3.bf16.msra.mxu0 %v276_v12  ;;  %2327 = vmatpush3.bf16.msra.mxu1 %v2569_v34  ;;  %v108_v12 = vpack.c.bf16 %v65_v10, %v64_v9  ;;  %v79_v34 = vld [vmem:[%s3480_s0 + $0x1b8] sm:$0xff] }
  0x1c   :  { %2396 = vmatprep.subr.bf16.mxu0 %v2572_v48 }
  0x1e   :  { %2253 = vmatmul.mubr.msk.bf16.vlgmr.msra.gmra.mrb[0].mxu0 %vm177_vm0, %v89_v15  ;;  %v68_v15 = vld [vmem:[%s3480_s0 + $0x160] sm:$0xff] }
  0x1f   :  { %2256 = vmatprep.mubr.msk.bf16.mxu0 %vm177_vm0, %v90_v16  ;;  %v69_v16 = vld [vmem:[%s3480_s0 + $0x168] sm:$0xff]  ;;  %2397 = vmatpush3.bf16.msra.mxu0 %v2572_v48 }
  0x20   :  { %v110_v18 = vpack.c.bf16 %v69_v16, %v68_v15  ;;  %2398 = vmatprep.subr.bf16.mxu0 %v2573_v53  ;;  %v2577_v15 = vld [vmem:[%s3481_s2 + $0x68] sm:$0xff]  }
  0x23   :  { %2399 = vmatpush3.bf16.msra.mxu0 %v2573_v53 }
  0x24   :  { %2400 = vmatprep.subr.bf16.mxu0 %v2574_v62 }
  0x26   :  { %2257 = vmatmul.mubr.msk.bf16.gmra.mrb[4].mxu0 %vm177_vm0, %v91_v24  ;;  %v2570_v24 = vld [vmem:[%s3481_s2 + $0x30] sm:$0xff]  }
  0x27   :  { %2260 = vmatprep.mubr.msk.bf16.mxu0 %vm177_vm0, %v92_v26  ;;  %2328 = vmatprep.subr.bf16.mxu1 %v2570_v24  ;;  %v2571_v26 = vld [vmem:[%s3481_s2 + $0x38] sm:$0xff]  }
  0x28   :  { %2329 = vmatpush3.bf16.msra.mxu1 %v2570_v24  ;;  %2401 = vmatpush3.bf16.msra.mxu0 %v2574_v62 }
  0x29   :  { %2330 = vmatprep.subr.bf16.mxu1 %v2571_v26 }
  0x2c   :  { %2331 = vmatpush3.bf16.msra.mxu1 %v2571_v26 }
  0x2e   :  { %2261 = vmatmul.mubr.msk.bf16.gmra.mrb[8].mxu0 %vm177_vm0, %v93_v32  ;;  %v114_v32 = vpack.c.bf16 %v77_v30, %v76_v29 }
  0x2f   :  { %2264 = vmatprep.mubr.msk.bf16.mxu0 %vm177_vm0, %v94_v33  ;;  %v78_v33 = vld [vmem:[%s3480_s0 + $0x1b0] sm:$0xff] }
  0x30   :  { %v115_v37 = vpack.c.bf16 %v79_v34, %v78_v33 }
  0x36   :  { %2265 = vmatmul.mubr.msk.bf16.gmra.mrb[12].mxu0 %vm177_vm0, %v95_v39  ;;  %v82_v39 = vld [vmem:[%s3480_s0 + $0x1d0] sm:$0xff] }
  0x37   :  { %2268 = vmatprep.mubr.msk.bf16.mxu0 %vm177_vm0, %v96_v40  ;;  %v83_v40 = vld [vmem:[%s3480_s0 + $0x1d8] sm:$0xff] }
  0x38   :  { %v117_v43 = vpack.c.bf16 %v83_v40, %v82_v39 }
  0x3e   :  { %2269 = vmatmul.mubr.msk.bf16.gmra.mrb[16].mxu0 %vm177_vm0, %v97_v45  ;;  %v86_v45 = vld [vmem:[%s3480_s0 + $0x1f0] sm:$0xff] }
  0x3f   :  { %2272 = vmatprep.mubr.msk.bf16.mxu0 %vm177_vm0, %v98_v46  ;;  %v87_v46 = vld [vmem:[%s3480_s0 + $0x1f8] sm:$0xff] }
  0x40   :  { %v119_v47 = vpack.c.bf16 %v87_v46, %v86_v45 }
  0x46   :  { %2273 = vmatmul.mubr.msk.bf16.gmra.mrb[20].mxu0 %vm177_vm0, %v99_v51  ;;  %v136_v51 = vsub.s32 0, %v2896_v50 }
  0x47   :  { %2276 = vmatprep.mubr.msk.bf16.mxu0 %vm177_vm0, %v100_v52  ;;  %v2902_v52 = vld [vmem:[%s3482_s3] sm:$0x7] }
  0x48   :  { %v2908_v54 = vrot.slane %v2902_v52, %v136_v51 }
  0x4e   :  { %2277 = vmatmul.mubr.msk.bf16.gmra.mrb[24].mxu0 %vm177_vm0, %v101_v57 }
  0x4f   :  { %2280 = vmatprep.mubr.msk.bf16.mxu0 %vm177_vm0, %v102_v58 }
  0x56   :  { %2281 = vmatmul.mubr.msk.bf16.gmra.mrb[28].mxu0 %vm177_vm0, %v103_v63  ;;  %v2575_v63 = vld [vmem:[%s3481_s2 + $0x58] sm:$0xff]  }
  0x57   :  { %2284 = vmatprep.mubr.msk.bf16.mxu0 %vm177_vm0, %v104_v0  ;;  %2402 = vmatprep.subr.bf16.mxu0 %v2575_v63 }
  0x58   :  { %2403 = vmatpush3.bf16.msra.mxu0 %v2575_v63 }
  0x5e   :  { %2285 = vmatmul.mubr.msk.bf16.gmra.mrb[32].mxu0 %vm177_vm0, %v105_v5 }
  0x5f   :  { %2288 = vmatprep.mubr.msk.bf16.mxu0 %vm177_vm0, %v106_v6  ;;  %v2576_v6 = vld [vmem:[%s3481_s2 + $0x60] sm:$0xff]  }
  0x60   :  { %2404 = vmatprep.subr.bf16.mxu0 %v2576_v6 }
  0x61   :  { %2405 = vmatpush3.bf16.msra.mxu0 %v2576_v6 }
  0x62   :  { %2406 = vmatprep.subr.bf16.mxu0 %v2577_v15 }
  0x65   :  { %2407 = vmatpush3.bf16.msra.mxu0 %v2577_v15 }
  0x66   :  { %2289 = vmatmul.mubr.msk.bf16.gmra.mrb[36].mxu0 %vm177_vm0, %v107_v11  ;;  %2408 = vmatprep.subr.bf16.mxu0 %v2578_v22 }
  0x67   :  { %2292 = vmatprep.mubr.msk.bf16.mxu0 %vm177_vm0, %v108_v12 }
  0x69   :  { %2409 = vmatpush3.bf16.msra.mxu0 %v2578_v22 }
  0x6e   :  { %2293 = vmatmul.mubr.msk.bf16.gmra.mrb[40].mxu0 %vm177_vm0, %v109_v17 }
  0x6f   :  { %2296 = vmatprep.mubr.msk.bf16.mxu0 %vm177_vm0, %v110_v18 }
  0x76   :  { %2297 = vmatmul.mubr.msk.bf16.gmra.mrb[44].mxu0 %vm177_vm0, %v111_v23 }
  0x77   :  { %2300 = vmatprep.mubr.msk.bf16.mxu0 %vm177_vm0, %v112_v25 }
  0x7e   :  { %2301 = vmatmul.mubr.msk.bf16.gmra.mrb[48].mxu0 %vm177_vm0, %v113_v31  ;;  %v2579_v31 = vld [vmem:[%s3481_s2 + $0x78] sm:$0xff]  }
  0x7f   :  { %2304 = vmatprep.mubr.msk.bf16.mxu0 %vm177_vm0, %v114_v32  ;;  %2410 = vmatprep.subr.bf16.mxu0 %v2579_v31 }
  0x80   :  { %2411 = vmatpush3.bf16.msra.mxu0 %v2579_v31 }
  0x86   :  { %2305 = vmatmul.mubr.msk.bf16.gmra.mrb[52].mxu0 %vm177_vm0, %v115_v37 }
  0x87   :  { %2308 = vmatprep.mubr.msk.bf16.mxu0 %vm177_vm0, %v116_v38 }
  0x8e   :  { %2309 = vmatmul.mubr.msk.bf16.gmra.mrb[56].mxu0 %vm177_vm0, %v117_v43 }
  0x8f   :  { %2312 = vmatprep.mubr.msk.bf16.mxu0 %vm177_vm0, %v118_v44 }
  0x96   :  { %2313 = vmatmul.mubr.msk.bf16.gmra.mrb[60].mxu0 %vm177_vm0, %v119_v47 }
  0xf1   :  { %v2254_v55 = vpop.f32.mrb[0].mxu0 }
  0xf2   :  { %v321_v56 = vadd.f32 %v2254_v55, %v2908_v54  ;;  %v312_v57 = vpop.f32.mrb[1].mxu0 }
  0xf3   :  { %v313_v58 = vadd.f32 %v312_v57, %v2908_v54  ;;  %v2255_v59 = vpop.f32.mrb[2].mxu0 }
  0xf4   :  { %v324_v60 = vadd.f32 %v2255_v59, %v2908_v54  ;;  %v315_v61 = vpop.f32.mrb[3].mxu0  ;;  %v569_v1 = vmax.f32 %v321_v56, 0.0 }
  0xf5   :  { %v316_v0 = vadd.f32 %v315_v61, %v2908_v54  ;;  %v567_v3 = vmax.f32 %v313_v58, 0.0 }
  0xf6   :  { %v570_v2 = vmax.f32 %v324_v60, 0.0 }
  0xf7   :  { %v568_v4 = vmax.f32 %v316_v0, 0.0 }
  0xf8   :  { %v632_v5 = vpack.c.bf16 %v570_v2, %v569_v1 }
  0xf9   :  { %v2258_v7 = vpop.f32.mrb[4].mxu0  ;;  %v631_v8 = vpack.c.bf16 %v568_v4, %v567_v3 }
  0xfa   :  { %v337_v9 = vadd.f32 %v2258_v7, %v2908_v54  ;;  %v328_v10 = vpop.f32.mrb[5].mxu0 }
  0xfb   :  { %v329_v11 = vadd.f32 %v328_v10, %v2908_v54  ;;  %v2259_v12 = vpop.f32.mrb[6].mxu0  ;;  %2332 = vmatprep.mubr.bf16.mxu1 %v631_v8 }
  0xfc   :  { %v340_v13 = vadd.f32 %v2259_v12, %v2908_v54  ;;  %v331_v14 = vpop.f32.mrb[7].mxu0  ;;  %2333 = vmatmul.mubr.bf16.vlgmr.msra.gmra.mrb[0].mxu1 %v632_v5  ;;  %v573_v17 = vmax.f32 %v337_v9, 0.0 }
  0xfd   :  { %v332_v16 = vadd.f32 %v331_v14, %v2908_v54  ;;  %v571_v19 = vmax.f32 %v329_v11, 0.0 }
  0xfe   :  { %v574_v18 = vmax.f32 %v340_v13, 0.0 }
  0xff   :  { %v572_v20 = vmax.f32 %v332_v16, 0.0 }
 0x100   :  { %v634_v21 = vpack.c.bf16 %v574_v18, %v573_v17 }
 0x101   :  { %v633_v23 = vpack.c.bf16 %v572_v20, %v571_v19  ;;  %v2262_v24 = vpop.f32.mrb[8].mxu0 }
 0x102   :  { %v353_v25 = vadd.f32 %v2262_v24, %v2908_v54  ;;  %v344_v26 = vpop.f32.mrb[9].mxu0 }
 0x103   :  { %v345_v27 = vadd.f32 %v344_v26, %v2908_v54  ;;  %v2263_v28 = vpop.f32.mrb[10].mxu0  ;;  %2336 = vmatprep.mubr.bf16.mxu1 %v633_v23 }
 0x104   :  { %v356_v29 = vadd.f32 %v2263_v28, %v2908_v54  ;;  %v347_v30 = vpop.f32.mrb[11].mxu0  ;;  %2337 = vmatmul.mubr.bf16.gmra.mrb[4].mxu1 %v634_v21  ;;  %v577_v33 = vmax.f32 %v353_v25, 0.0 }
 0x105   :  { %v348_v32 = vadd.f32 %v347_v30, %v2908_v54  ;;  %v575_v35 = vmax.f32 %v345_v27, 0.0 }
 0x106   :  { %v578_v34 = vmax.f32 %v356_v29, 0.0 }
 0x107   :  { %v576_v36 = vmax.f32 %v348_v32, 0.0 }
 0x108   :  { %v636_v37 = vpack.c.bf16 %v578_v34, %v577_v33 }
 0x109   :  { %v635_v38 = vpack.c.bf16 %v576_v36, %v575_v35  ;;  %v2266_v39 = vpop.f32.mrb[12].mxu0 }
 0x10a   :  { %v369_v40 = vadd.f32 %v2266_v39, %v2908_v54  ;;  %v360_v41 = vpop.f32.mrb[13].mxu0 }
 0x10b   :  { %v361_v42 = vadd.f32 %v360_v41, %v2908_v54  ;;  %v2267_v43 = vpop.f32.mrb[14].mxu0  ;;  %2340 = vmatprep.mubr.bf16.mxu1 %v635_v38 }
 0x10c   :  { %v372_v44 = vadd.f32 %v2267_v43, %v2908_v54  ;;  %v363_v45 = vpop.f32.mrb[15].mxu0  ;;  %2341 = vmatmul.mubr.bf16.gmra.mrb[8].mxu1 %v636_v37  ;;  %v581_v47 = vmax.f32 %v369_v40, 0.0 }
 0x10d   :  { %v364_v46 = vadd.f32 %v363_v45, %v2908_v54  ;;  %v579_v49 = vmax.f32 %v361_v42, 0.0 }
 0x10e   :  { %v582_v48 = vmax.f32 %v372_v44, 0.0 }
 0x10f   :  { %v580_v51 = vmax.f32 %v364_v46, 0.0 }
 0x110   :  { %v638_v53 = vpack.c.bf16 %v582_v48, %v581_v47 }
 0x111   :  { %v637_v55 = vpack.c.bf16 %v580_v51, %v579_v49  ;;  %v2270_v56 = vpop.f32.mrb[16].mxu0 }
 0x112   :  { %v385_v57 = vadd.f32 %v2270_v56, %v2908_v54  ;;  %v376_v58 = vpop.f32.mrb[17].mxu0 }
 0x113   :  { %v377_v59 = vadd.f32 %v376_v58, %v2908_v54  ;;  %v2271_v60 = vpop.f32.mrb[18].mxu0  ;;  %2344 = vmatprep.mubr.bf16.mxu1 %v637_v55 }
 0x114   :  { %v388_v61 = vadd.f32 %v2271_v60, %v2908_v54  ;;  %v379_v62 = vpop.f32.mrb[19].mxu0  ;;  %2345 = vmatmul.mubr.bf16.gmra.mrb[12].mxu1 %v638_v53  ;;  %v585_v0 = vmax.f32 %v385_v57, 0.0 }
 0x115   :  { %v380_v63 = vadd.f32 %v379_v62, %v2908_v54  ;;  %v583_v2 = vmax.f32 %v377_v59, 0.0 }
 0x116   :  { %v586_v1 = vmax.f32 %v388_v61, 0.0 }
 0x117   :  { %v584_v3 = vmax.f32 %v380_v63, 0.0 }
 0x118   :  { %v640_v4 = vpack.c.bf16 %v586_v1, %v585_v0 }
 0x119   :  { %v639_v5 = vpack.c.bf16 %v584_v3, %v583_v2  ;;  %v2274_v6 = vpop.f32.mrb[20].mxu0 }
 0x11a   :  { %v401_v7 = vadd.f32 %v2274_v6, %v2908_v54  ;;  %v392_v8 = vpop.f32.mrb[21].mxu0 }
 0x11b   :  { %v393_v9 = vadd.f32 %v392_v8, %v2908_v54  ;;  %v2275_v10 = vpop.f32.mrb[22].mxu0  ;;  %2348 = vmatprep.mubr.bf16.mxu1 %v639_v5 }
 0x11c   :  { %v404_v11 = vadd.f32 %v2275_v10, %v2908_v54  ;;  %v395_v12 = vpop.f32.mrb[23].mxu0  ;;  %2349 = vmatmul.mubr.bf16.gmra.mrb[16].mxu1 %v640_v4  ;;  %v589_v14 = vmax.f32 %v401_v7, 0.0 }
 0x11d   :  { %v396_v13 = vadd.f32 %v395_v12, %v2908_v54  ;;  %v587_v16 = vmax.f32 %v393_v9, 0.0 }
 0x11e   :  { %v590_v15 = vmax.f32 %v404_v11, 0.0 }
 0x11f   :  { %v588_v17 = vmax.f32 %v396_v13, 0.0 }
 0x120   :  { %v642_v18 = vpack.c.bf16 %v590_v15, %v589_v14 }
 0x121   :  { %v641_v19 = vpack.c.bf16 %v588_v17, %v587_v16  ;;  %v2278_v20 = vpop.f32.mrb[24].mxu0 }
 0x122   :  { %v417_v21 = vadd.f32 %v2278_v20, %v2908_v54  ;;  %v408_v22 = vpop.f32.mrb[25].mxu0 }
 0x123   :  { %v409_v23 = vadd.f32 %v408_v22, %v2908_v54  ;;  %v2279_v24 = vpop.f32.mrb[26].mxu0  ;;  %2352 = vmatprep.mubr.bf16.mxu1 %v641_v19 }
 0x124   :  { %v420_v25 = vadd.f32 %v2279_v24, %v2908_v54  ;;  %v411_v26 = vpop.f32.mrb[27].mxu0  ;;  %2353 = vmatmul.mubr.bf16.gmra.mrb[20].mxu1 %v642_v18  ;;  %v593_v28 = vmax.f32 %v417_v21, 0.0 }
 0x125   :  { %v412_v27 = vadd.f32 %v411_v26, %v2908_v54  ;;  %v591_v30 = vmax.f32 %v409_v23, 0.0 }
 0x126   :  { %v594_v29 = vmax.f32 %v420_v25, 0.0 }
 0x127   :  { %v592_v31 = vmax.f32 %v412_v27, 0.0 }
 0x128   :  { %v644_v32 = vpack.c.bf16 %v594_v29, %v593_v28 }
 0x129   :  { %v643_v33 = vpack.c.bf16 %v592_v31, %v591_v30  ;;  %v2282_v34 = vpop.f32.mrb[28].mxu0 }
 0x12a   :  { %v433_v35 = vadd.f32 %v2282_v34, %v2908_v54  ;;  %v424_v36 = vpop.f32.mrb[29].mxu0 }
 0x12b   :  { %v425_v37 = vadd.f32 %v424_v36, %v2908_v54  ;;  %v2283_v38 = vpop.f32.mrb[30].mxu0  ;;  %2356 = vmatprep.mubr.bf16.mxu1 %v643_v33 }
 0x12c   :  { %v436_v39 = vadd.f32 %v2283_v38, %v2908_v54  ;;  %v427_v40 = vpop.f32.mrb[31].mxu0  ;;  %2357 = vmatmul.mubr.bf16.gmra.mrb[24].mxu1 %v644_v32  ;;  %v597_v42 = vmax.f32 %v433_v35, 0.0 }
 0x12d   :  { %v428_v41 = vadd.f32 %v427_v40, %v2908_v54  ;;  %v595_v44 = vmax.f32 %v425_v37, 0.0 }
 0x12e   :  { %v598_v43 = vmax.f32 %v436_v39, 0.0 }
 0x12f   :  { %v596_v45 = vmax.f32 %v428_v41, 0.0 }
 0x130   :  { %v646_v46 = vpack.c.bf16 %v598_v43, %v597_v42 }
 0x131   :  { %v645_v47 = vpack.c.bf16 %v596_v45, %v595_v44  ;;  %v2286_v48 = vpop.f32.mrb[32].mxu0 }
 0x132   :  { %v449_v49 = vadd.f32 %v2286_v48, %v2908_v54  ;;  %v440_v51 = vpop.f32.mrb[33].mxu0 }
 0x133   :  { %v441_v53 = vadd.f32 %v440_v51, %v2908_v54  ;;  %v2287_v55 = vpop.f32.mrb[34].mxu0  ;;  %2360 = vmatprep.mubr.bf16.mxu1 %v645_v47 }
 0x134   :  { %v452_v56 = vadd.f32 %v2287_v55, %v2908_v54  ;;  %v443_v57 = vpop.f32.mrb[35].mxu0  ;;  %2361 = vmatmul.mubr.bf16.gmra.mrb[28].mxu1 %v646_v46  ;;  %v601_v59 = vmax.f32 %v449_v49, 0.0 }
 0x135   :  { %v444_v58 = vadd.f32 %v443_v57, %v2908_v54  ;;  %v599_v61 = vmax.f32 %v441_v53, 0.0 }
 0x136   :  { %v602_v60 = vmax.f32 %v452_v56, 0.0 }
 0x137   :  { %v600_v62 = vmax.f32 %v444_v58, 0.0 }
 0x138   :  { %v648_v63 = vpack.c.bf16 %v602_v60, %v601_v59 }
 0x139   :  { %v647_v0 = vpack.c.bf16 %v600_v62, %v599_v61  ;;  %v2290_v1 = vpop.f32.mrb[36].mxu0 }
 0x13a   :  { %v465_v2 = vadd.f32 %v2290_v1, %v2908_v54  ;;  %v456_v3 = vpop.f32.mrb[37].mxu0 }
 0x13b   :  { %v457_v4 = vadd.f32 %v456_v3, %v2908_v54  ;;  %v2291_v5 = vpop.f32.mrb[38].mxu0  ;;  %2364 = vmatprep.mubr.bf16.mxu1 %v647_v0 }
 0x13c   :  { %v468_v6 = vadd.f32 %v2291_v5, %v2908_v54  ;;  %v459_v7 = vpop.f32.mrb[39].mxu0  ;;  %2365 = vmatmul.mubr.bf16.gmra.mrb[32].mxu1 %v648_v63  ;;  %v605_v9 = vmax.f32 %v465_v2, 0.0 }
 0x13d   :  { %v460_v8 = vadd.f32 %v459_v7, %v2908_v54  ;;  %v603_v11 = vmax.f32 %v457_v4, 0.0 }
 0x13e   :  { %v606_v10 = vmax.f32 %v468_v6, 0.0 }
 0x13f   :  { %v604_v12 = vmax.f32 %v460_v8, 0.0 }
 0x140   :  { %v650_v13 = vpack.c.bf16 %v606_v10, %v605_v9 }
 0x141   :  { %v649_v14 = vpack.c.bf16 %v604_v12, %v603_v11  ;;  %v2294_v15 = vpop.f32.mrb[40].mxu0 }
 0x142   :  { %v481_v16 = vadd.f32 %v2294_v15, %v2908_v54  ;;  %v472_v17 = vpop.f32.mrb[41].mxu0 }
 0x143   :  { %v473_v18 = vadd.f32 %v472_v17, %v2908_v54  ;;  %v2295_v19 = vpop.f32.mrb[42].mxu0  ;;  %2368 = vmatprep.mubr.bf16.mxu1 %v649_v14 }
 0x144   :  { %v484_v20 = vadd.f32 %v2295_v19, %v2908_v54  ;;  %v475_v21 = vpop.f32.mrb[43].mxu0  ;;  %2369 = vmatmul.mubr.bf16.gmra.mrb[36].mxu1 %v650_v13  ;;  %v609_v23 = vmax.f32 %v481_v16, 0.0 }
 0x145   :  { %v476_v22 = vadd.f32 %v475_v21, %v2908_v54  ;;  %v607_v25 = vmax.f32 %v473_v18, 0.0 }
 0x146   :  { %v610_v24 = vmax.f32 %v484_v20, 0.0 }
 0x147   :  { %v608_v26 = vmax.f32 %v476_v22, 0.0 }
 0x148   :  { %v652_v27 = vpack.c.bf16 %v610_v24, %v609_v23 }
 0x149   :  { %v651_v28 = vpack.c.bf16 %v608_v26, %v607_v25  ;;  %v2298_v29 = vpop.f32.mrb[44].mxu0 }
 0x14a   :  { %v497_v30 = vadd.f32 %v2298_v29, %v2908_v54  ;;  %v488_v31 = vpop.f32.mrb[45].mxu0 }
 0x14b   :  { %v489_v32 = vadd.f32 %v488_v31, %v2908_v54  ;;  %v2299_v33 = vpop.f32.mrb[46].mxu0  ;;  %2372 = vmatprep.mubr.bf16.mxu1 %v651_v28 }
 0x14c   :  { %v500_v34 = vadd.f32 %v2299_v33, %v2908_v54  ;;  %v491_v35 = vpop.f32.mrb[47].mxu0  ;;  %2373 = vmatmul.mubr.bf16.gmra.mrb[40].mxu1 %v652_v27  ;;  %v613_v37 = vmax.f32 %v497_v30, 0.0 }
 0x14d   :  { %v492_v36 = vadd.f32 %v491_v35, %v2908_v54  ;;  %v611_v39 = vmax.f32 %v489_v32, 0.0 }
 0x14e   :  { %v614_v38 = vmax.f32 %v500_v34, 0.0 }
 0x14f   :  { %v612_v40 = vmax.f32 %v492_v36, 0.0 }
 0x150   :  { %v654_v41 = vpack.c.bf16 %v614_v38, %v613_v37  ;;  %v2580_v38 = vld [vmem:[%s3483_s4] sm:$0xff]  }
 0x151   :  { %v653_v42 = vpack.c.bf16 %v612_v40, %v611_v39  ;;  %v2302_v43 = vpop.f32.mrb[48].mxu0  ;;  %2476 = vmatprep.subr.bf16.mxu1 %v2580_v38  ;;  %v681_v39 = vsub.s32 1, %v2896_v50 }
 0x152   :  { %v513_v44 = vadd.f32 %v2302_v43, %v2908_v54  ;;  %v504_v45 = vpop.f32.mrb[49].mxu0  ;;  %2477 = vmatpush3.bf16.msra.mxu1 %v2580_v38 }
 0x153   :  { %v505_v46 = vadd.f32 %v504_v45, %v2908_v54  ;;  %v2303_v47 = vpop.f32.mrb[50].mxu0  ;;  %2376 = vmatprep.mubr.bf16.mxu1 %v653_v42  ;;  %v3000_v40 = vrot.slane %v2902_v52, %v681_v39  ;;  %v2583_v52 = vld [vmem:[%s3483_s4 + $0x18] sm:$0xff]  }
 0x154   :  { %v516_v48 = vadd.f32 %v2303_v47, %v2908_v54  ;;  %v507_v49 = vpop.f32.mrb[51].mxu0  ;;  %2377 = vmatmul.mubr.bf16.gmra.mrb[44].mxu1 %v654_v41  ;;  %v617_v53 = vmax.f32 %v513_v44, 0.0 }
 0x155   :  { %v508_v51 = vadd.f32 %v507_v49, %v2908_v54  ;;  %v615_v56 = vmax.f32 %v505_v46, 0.0 }
 0x156   :  { %v618_v55 = vmax.f32 %v516_v48, 0.0  ;;  %v2582_v48 = vld [vmem:[%s3483_s4 + $0x10] sm:$0xff]  }
 0x157   :  { %v616_v57 = vmax.f32 %v508_v51, 0.0 }
 0x158   :  { %v656_v58 = vpack.c.bf16 %v618_v55, %v617_v53 }
 0x159   :  { %v655_v59 = vpack.c.bf16 %v616_v57, %v615_v56  ;;  %v2306_v60 = vpop.f32.mrb[52].mxu0 }
 0x15a   :  { %v529_v61 = vadd.f32 %v2306_v60, %v2908_v54  ;;  %v520_v62 = vpop.f32.mrb[53].mxu0 }
 0x15b   :  { %v521_v63 = vadd.f32 %v520_v62, %v2908_v54  ;;  %v2307_v0 = vpop.f32.mrb[54].mxu0  ;;  %2380 = vmatprep.mubr.bf16.mxu1 %v655_v59 }
 0x15c   :  { %v532_v1 = vadd.f32 %v2307_v0, %v2908_v54  ;;  %v523_v2 = vpop.f32.mrb[55].mxu0  ;;  %2381 = vmatmul.mubr.bf16.gmra.mrb[48].mxu1 %v656_v58  ;;  %v621_v4 = vmax.f32 %v529_v61, 0.0  ;;  %v2584_v58 = vld [vmem:[%s3483_s4 + $0x20] sm:$0xff]  }
 0x15d   :  { %v524_v3 = vadd.f32 %v523_v2, %v2908_v54  ;;  %v619_v6 = vmax.f32 %v521_v63, 0.0 }
 0x15e   :  { %v622_v5 = vmax.f32 %v532_v1, 0.0 }
 0x15f   :  { %v620_v7 = vmax.f32 %v524_v3, 0.0  ;;  %v2585_v3 = vld [vmem:[%s3483_s4 + $0x28] sm:$0xff]  }
 0x160   :  { %v658_v8 = vpack.c.bf16 %v622_v5, %v621_v4 }
 0x161   :  { %v657_v9 = vpack.c.bf16 %v620_v7, %v619_v6  ;;  %v2310_v10 = vpop.f32.mrb[56].mxu0 }
 0x162   :  { %v545_v11 = vadd.f32 %v2310_v10, %v2908_v54  ;;  %v536_v12 = vpop.f32.mrb[57].mxu0  ;;  %v2586_v10 = vld [vmem:[%s3483_s4 + $0x30] sm:$0xff]  }
 0x163   :  { %v537_v13 = vadd.f32 %v536_v12, %v2908_v54  ;;  %v2311_v14 = vpop.f32.mrb[58].mxu0  ;;  %2384 = vmatprep.mubr.bf16.mxu1 %v657_v9 }
 0x164   :  { %v548_v15 = vadd.f32 %v2311_v14, %v2908_v54  ;;  %v539_v16 = vpop.f32.mrb[59].mxu0  ;;  %2385 = vmatmul.mubr.bf16.gmra.mrb[52].mxu1 %v658_v8  ;;  %v625_v18 = vmax.f32 %v545_v11, 0.0 }
 0x165   :  { %v540_v17 = vadd.f32 %v539_v16, %v2908_v54  ;;  %v623_v20 = vmax.f32 %v537_v13, 0.0 }
 0x166   :  { %v626_v19 = vmax.f32 %v548_v15, 0.0 }
 0x167   :  { %v624_v21 = vmax.f32 %v540_v17, 0.0 }
 0x168   :  { %v660_v22 = vpack.c.bf16 %v626_v19, %v625_v18  ;;  %v2587_v19 = vld [vmem:[%s3483_s4 + $0x38] sm:$0xff]  }
 0x169   :  { %v659_v23 = vpack.c.bf16 %v624_v21, %v623_v20  ;;  %v2314_v24 = vpop.f32.mrb[60].mxu0 }
 0x16a   :  { %v561_v25 = vadd.f32 %v2314_v24, %v2908_v54  ;;  %v552_v26 = vpop.f32.mrb[61].mxu0 }
 0x16b   :  { %v553_v27 = vadd.f32 %v552_v26, %v2908_v54  ;;  %v2315_v28 = vpop.f32.mrb[62].mxu0  ;;  %2388 = vmatprep.mubr.bf16.mxu1 %v659_v23 }
 0x16c   :  { %v564_v29 = vadd.f32 %v2315_v28, %v2908_v54  ;;  %v555_v30 = vpop.f32.mrb[63].mxu0  ;;  %2389 = vmatmul.mubr.bf16.gmra.mrb[56].mxu1 %v660_v22  ;;  %v629_v32 = vmax.f32 %v561_v25, 0.0 }
 0x16d   :  { %v556_v31 = vadd.f32 %v555_v30, %v2908_v54  ;;  %v627_v34 = vmax.f32 %v553_v27, 0.0  ;;  %v2581_v54 = vld [vmem:[%s3483_s4 + $0x8] sm:$0xff]  }
 0x16e   :  { %v630_v33 = vmax.f32 %v564_v29, 0.0  ;;  %2478 = vmatprep.subr.bf16.mxu1 %v2581_v54 }
 0x16f   :  { %v628_v35 = vmax.f32 %v556_v31, 0.0  ;;  %2479 = vmatpush3.bf16.msra.mxu1 %v2581_v54 }
 0x170   :  { %v662_v36 = vpack.c.bf16 %v630_v33, %v629_v32  ;;  %2480 = vmatprep.subr.bf16.mxu1 %v2582_v48 }
 0x171   :  { %v661_v37 = vpack.c.bf16 %v628_v35, %v627_v34 }
 0x173   :  { %2392 = vmatprep.mubr.bf16.mxu1 %v661_v37  ;;  %2481 = vmatpush3.bf16.msra.mxu1 %v2582_v48 }
 0x174   :  { %2393 = vmatmul.mubr.bf16.gmra.mrb[60].mxu1 %v662_v36  ;;  %2482 = vmatprep.subr.bf16.mxu1 %v2583_v52 }
 0x177   :  { %2483 = vmatpush3.bf16.msra.mxu1 %v2583_v52 }
 0x178   :  { %2484 = vmatprep.subr.bf16.mxu1 %v2584_v58 }
 0x17b   :  { %2485 = vmatpush3.bf16.msra.mxu1 %v2584_v58 }
 0x17c   :  { %2486 = vmatprep.subr.bf16.mxu1 %v2585_v3 }
 0x17f   :  { %2487 = vmatpush3.bf16.msra.mxu1 %v2585_v3 }
 0x180   :  { %2488 = vmatprep.subr.bf16.mxu1 %v2586_v10 }
 0x183   :  { %2489 = vmatpush3.bf16.msra.mxu1 %v2586_v10 }
 0x184   :  { %2490 = vmatprep.subr.bf16.mxu1 %v2587_v19 }
 0x187   :  { %2491 = vmatpush3.bf16.msra.mxu1 %v2587_v19 }
 0x1cf   :  { %v2334_v41 = vpop.f32.mrb[0].mxu1 }
 0x1d0   :  { %v774_v42 = vadd.f32 %v2334_v41, %v3000_v40  ;;  %v765_v43 = vpop.f32.mrb[1].mxu1 }
 0x1d1   :  { %v766_v44 = vadd.f32 %v765_v43, %v3000_v40  ;;  %v2335_v45 = vpop.f32.mrb[2].mxu1 }
 0x1d2   :  { %v777_v46 = vadd.f32 %v2335_v45, %v3000_v40  ;;  %v768_v47 = vpop.f32.mrb[3].mxu1  ;;  %v1022_v51 = vmax.f32 %v774_v42, 0.0 }
 0x1d3   :  { %v769_v49 = vadd.f32 %v768_v47, %v3000_v40  ;;  %v1020_v55 = vmax.f32 %v766_v44, 0.0 }
 0x1d4   :  { %v1023_v53 = vmax.f32 %v777_v46, 0.0 }
 0x1d5   :  { %v1021_v56 = vmax.f32 %v769_v49, 0.0 }
 0x1d6   :  { %v1085_v57 = vpack.c.bf16 %v1023_v53, %v1022_v51 }
 0x1d7   :  { %v1084_v59 = vpack.c.bf16 %v1021_v56, %v1020_v55  ;;  %v2338_v60 = vpop.f32.mrb[4].mxu1 }
 0x1d8   :  { %v790_v61 = vadd.f32 %v2338_v60, %v3000_v40  ;;  %v781_v62 = vpop.f32.mrb[5].mxu1 }
 0x1d9   :  { %v782_v63 = vadd.f32 %v781_v62, %v3000_v40  ;;  %v2339_v0 = vpop.f32.mrb[6].mxu1  ;;  %2412 = vmatprep.mubr.bf16.mxu0 %v1084_v59 }
 0x1da   :  { %v793_v1 = vadd.f32 %v2339_v0, %v3000_v40  ;;  %v784_v2 = vpop.f32.mrb[7].mxu1  ;;  %2413 = vmatmul.mubr.bf16.vlgmr.msra.gmra.mrb[64].mxu0 %v1085_v57  ;;  %v1026_v5 = vmax.f32 %v790_v61, 0.0 }
 0x1db   :  { %v785_v4 = vadd.f32 %v784_v2, %v3000_v40  ;;  %v1024_v7 = vmax.f32 %v782_v63, 0.0 }
 0x1dc   :  { %v1027_v6 = vmax.f32 %v793_v1, 0.0 }
 0x1dd   :  { %v1025_v8 = vmax.f32 %v785_v4, 0.0 }
 0x1de   :  { %v1087_v9 = vpack.c.bf16 %v1027_v6, %v1026_v5 }
 0x1df   :  { %v1086_v11 = vpack.c.bf16 %v1025_v8, %v1024_v7  ;;  %v2342_v12 = vpop.f32.mrb[8].mxu1 }
 0x1e0   :  { %v806_v13 = vadd.f32 %v2342_v12, %v3000_v40  ;;  %v797_v14 = vpop.f32.mrb[9].mxu1 }
 0x1e1   :  { %v798_v15 = vadd.f32 %v797_v14, %v3000_v40  ;;  %v2343_v16 = vpop.f32.mrb[10].mxu1  ;;  %2416 = vmatprep.mubr.bf16.mxu0 %v1086_v11 }
 0x1e2   :  { %v809_v17 = vadd.f32 %v2343_v16, %v3000_v40  ;;  %v800_v18 = vpop.f32.mrb[11].mxu1  ;;  %2417 = vmatmul.mubr.bf16.gmra.mrb[68].mxu0 %v1087_v9  ;;  %v1030_v21 = vmax.f32 %v806_v13, 0.0 }
 0x1e3   :  { %v801_v20 = vadd.f32 %v800_v18, %v3000_v40  ;;  %v1028_v23 = vmax.f32 %v798_v15, 0.0 }
 0x1e4   :  { %v1031_v22 = vmax.f32 %v809_v17, 0.0 }
 0x1e5   :  { %v1029_v24 = vmax.f32 %v801_v20, 0.0 }
 0x1e6   :  { %v1089_v25 = vpack.c.bf16 %v1031_v22, %v1030_v21 }
 0x1e7   :  { %v1088_v26 = vpack.c.bf16 %v1029_v24, %v1028_v23  ;;  %v2346_v27 = vpop.f32.mrb[12].mxu1 }
 0x1e8   :  { %v822_v28 = vadd.f32 %v2346_v27, %v3000_v40  ;;  %v813_v29 = vpop.f32.mrb[13].mxu1 }
 0x1e9   :  { %v814_v30 = vadd.f32 %v813_v29, %v3000_v40  ;;  %v2347_v31 = vpop.f32.mrb[14].mxu1  ;;  %2420 = vmatprep.mubr.bf16.mxu0 %v1088_v26 }
 0x1ea   :  { %v825_v32 = vadd.f32 %v2347_v31, %v3000_v40  ;;  %v816_v33 = vpop.f32.mrb[15].mxu1  ;;  %2421 = vmatmul.mubr.bf16.gmra.mrb[72].mxu0 %v1089_v25  ;;  %v1034_v35 = vmax.f32 %v822_v28, 0.0 }
 0x1eb   :  { %v817_v34 = vadd.f32 %v816_v33, %v3000_v40  ;;  %v1032_v37 = vmax.f32 %v814_v30, 0.0 }
 0x1ec   :  { %v1035_v36 = vmax.f32 %v825_v32, 0.0 }
 0x1ed   :  { %v1033_v38 = vmax.f32 %v817_v34, 0.0 }
 0x1ee   :  { %v1091_v39 = vpack.c.bf16 %v1035_v36, %v1034_v35 }
 0x1ef   :  { %v1090_v54 = vpack.c.bf16 %v1033_v38, %v1032_v37  ;;  %v2350_v41 = vpop.f32.mrb[16].mxu1 }
 0x1f0   :  { %v838_v42 = vadd.f32 %v2350_v41, %v3000_v40  ;;  %v829_v43 = vpop.f32.mrb[17].mxu1 }
 0x1f1   :  { %v830_v44 = vadd.f32 %v829_v43, %v3000_v40  ;;  %v2351_v45 = vpop.f32.mrb[18].mxu1  ;;  %2424 = vmatprep.mubr.bf16.mxu0 %v1090_v54 }
 0x1f2   :  { %v841_v46 = vadd.f32 %v2351_v45, %v3000_v40  ;;  %v832_v47 = vpop.f32.mrb[19].mxu1  ;;  %2425 = vmatmul.mubr.bf16.gmra.mrb[76].mxu0 %v1091_v39  ;;  %v1038_v52 = vmax.f32 %v838_v42, 0.0 }
 0x1f3   :  { %v833_v48 = vadd.f32 %v832_v47, %v3000_v40  ;;  %v1036_v51 = vmax.f32 %v830_v44, 0.0 }
 0x1f4   :  { %v1039_v49 = vmax.f32 %v841_v46, 0.0 }
 0x1f5   :  { %v1037_v53 = vmax.f32 %v833_v48, 0.0 }
 0x1f6   :  { %v1093_v55 = vpack.c.bf16 %v1039_v49, %v1038_v52 }
 0x1f7   :  { %v1092_v56 = vpack.c.bf16 %v1037_v53, %v1036_v51  ;;  %v2354_v57 = vpop.f32.mrb[20].mxu1 }
 0x1f8   :  { %v854_v58 = vadd.f32 %v2354_v57, %v3000_v40  ;;  %v845_v59 = vpop.f32.mrb[21].mxu1 }
 0x1f9   :  { %v846_v60 = vadd.f32 %v845_v59, %v3000_v40  ;;  %v2355_v61 = vpop.f32.mrb[22].mxu1  ;;  %2428 = vmatprep.mubr.bf16.mxu0 %v1092_v56 }
 0x1fa   :  { %v857_v62 = vadd.f32 %v2355_v61, %v3000_v40  ;;  %v848_v63 = vpop.f32.mrb[23].mxu1  ;;  %2429 = vmatmul.mubr.bf16.gmra.mrb[80].mxu0 %v1093_v55  ;;  %v1042_v1 = vmax.f32 %v854_v58, 0.0 }
 0x1fb   :  { %v849_v0 = vadd.f32 %v848_v63, %v3000_v40  ;;  %v1040_v3 = vmax.f32 %v846_v60, 0.0 }
 0x1fc   :  { %v1043_v2 = vmax.f32 %v857_v62, 0.0 }
 0x1fd   :  { %v1041_v4 = vmax.f32 %v849_v0, 0.0 }
 0x1fe   :  { %v1095_v5 = vpack.c.bf16 %v1043_v2, %v1042_v1 }
 0x1ff   :  { %v1094_v6 = vpack.c.bf16 %v1041_v4, %v1040_v3  ;;  %v2358_v7 = vpop.f32.mrb[24].mxu1 }
 0x200   :  { %v870_v8 = vadd.f32 %v2358_v7, %v3000_v40  ;;  %v861_v9 = vpop.f32.mrb[25].mxu1 }
 0x201   :  { %v862_v10 = vadd.f32 %v861_v9, %v3000_v40  ;;  %v2359_v11 = vpop.f32.mrb[26].mxu1  ;;  %2432 = vmatprep.mubr.bf16.mxu0 %v1094_v6 }
 0x202   :  { %v873_v12 = vadd.f32 %v2359_v11, %v3000_v40  ;;  %v864_v13 = vpop.f32.mrb[27].mxu1  ;;  %2433 = vmatmul.mubr.bf16.gmra.mrb[84].mxu0 %v1095_v5  ;;  %v1046_v15 = vmax.f32 %v870_v8, 0.0 }
 0x203   :  { %v865_v14 = vadd.f32 %v864_v13, %v3000_v40  ;;  %v1044_v17 = vmax.f32 %v862_v10, 0.0 }
 0x204   :  { %v1047_v16 = vmax.f32 %v873_v12, 0.0 }
 0x205   :  { %v1045_v18 = vmax.f32 %v865_v14, 0.0 }
 0x206   :  { %v1097_v19 = vpack.c.bf16 %v1047_v16, %v1046_v15 }
 0x207   :  { %v1096_v20 = vpack.c.bf16 %v1045_v18, %v1044_v17  ;;  %v2362_v21 = vpop.f32.mrb[28].mxu1 }
 0x208   :  { %v886_v22 = vadd.f32 %v2362_v21, %v3000_v40  ;;  %v877_v23 = vpop.f32.mrb[29].mxu1 }
 0x209   :  { %v878_v24 = vadd.f32 %v877_v23, %v3000_v40  ;;  %v2363_v25 = vpop.f32.mrb[30].mxu1  ;;  %2436 = vmatprep.mubr.bf16.mxu0 %v1096_v20 }
 0x20a   :  { %v889_v26 = vadd.f32 %v2363_v25, %v3000_v40  ;;  %v880_v27 = vpop.f32.mrb[31].mxu1  ;;  %2437 = vmatmul.mubr.bf16.gmra.mrb[88].mxu0 %v1097_v19  ;;  %v1050_v29 = vmax.f32 %v886_v22, 0.0 }
 0x20b   :  { %v881_v28 = vadd.f32 %v880_v27, %v3000_v40  ;;  %v1048_v31 = vmax.f32 %v878_v24, 0.0 }
 0x20c   :  { %v1051_v30 = vmax.f32 %v889_v26, 0.0 }
 0x20d   :  { %v1049_v32 = vmax.f32 %v881_v28, 0.0 }
 0x20e   :  { %v1099_v33 = vpack.c.bf16 %v1051_v30, %v1050_v29 }
 0x20f   :  { %v1098_v34 = vpack.c.bf16 %v1049_v32, %v1048_v31  ;;  %v2366_v35 = vpop.f32.mrb[32].mxu1 }
 0x210   :  { %v902_v36 = vadd.f32 %v2366_v35, %v3000_v40  ;;  %v893_v37 = vpop.f32.mrb[33].mxu1 }
 0x211   :  { %v894_v38 = vadd.f32 %v893_v37, %v3000_v40  ;;  %v2367_v39 = vpop.f32.mrb[34].mxu1  ;;  %2440 = vmatprep.mubr.bf16.mxu0 %v1098_v34 }
 0x212   :  { %v905_v54 = vadd.f32 %v2367_v39, %v3000_v40  ;;  %v896_v41 = vpop.f32.mrb[35].mxu1  ;;  %2441 = vmatmul.mubr.bf16.gmra.mrb[92].mxu0 %v1099_v33  ;;  %v1054_v43 = vmax.f32 %v902_v36, 0.0 }
 0x213   :  { %v897_v42 = vadd.f32 %v896_v41, %v3000_v40  ;;  %v1052_v45 = vmax.f32 %v894_v38, 0.0 }
 0x214   :  { %v1055_v44 = vmax.f32 %v905_v54, 0.0 }
 0x215   :  { %v1053_v46 = vmax.f32 %v897_v42, 0.0 }
 0x216   :  { %v1101_v47 = vpack.c.bf16 %v1055_v44, %v1054_v43 }
 0x217   :  { %v1100_v48 = vpack.c.bf16 %v1053_v46, %v1052_v45  ;;  %v2370_v52 = vpop.f32.mrb[36].mxu1 }
 0x218   :  { %v918_v49 = vadd.f32 %v2370_v52, %v3000_v40  ;;  %v909_v51 = vpop.f32.mrb[37].mxu1 }
 0x219   :  { %v910_v53 = vadd.f32 %v909_v51, %v3000_v40  ;;  %v2371_v55 = vpop.f32.mrb[38].mxu1  ;;  %2444 = vmatprep.mubr.bf16.mxu0 %v1100_v48 }
 0x21a   :  { %v921_v56 = vadd.f32 %v2371_v55, %v3000_v40  ;;  %v912_v57 = vpop.f32.mrb[39].mxu1  ;;  %2445 = vmatmul.mubr.bf16.gmra.mrb[96].mxu0 %v1101_v47  ;;  %v1058_v59 = vmax.f32 %v918_v49, 0.0 }
 0x21b   :  { %v913_v58 = vadd.f32 %v912_v57, %v3000_v40  ;;  %v1056_v61 = vmax.f32 %v910_v53, 0.0 }
 0x21c   :  { %v1059_v60 = vmax.f32 %v921_v56, 0.0 }
 0x21d   :  { %v1057_v62 = vmax.f32 %v913_v58, 0.0 }
 0x21e   :  { %v1103_v63 = vpack.c.bf16 %v1059_v60, %v1058_v59 }
 0x21f   :  { %v1102_v0 = vpack.c.bf16 %v1057_v62, %v1056_v61  ;;  %v2374_v1 = vpop.f32.mrb[40].mxu1 }
 0x220   :  { %v934_v2 = vadd.f32 %v2374_v1, %v3000_v40  ;;  %v925_v3 = vpop.f32.mrb[41].mxu1 }
 0x221   :  { %v926_v4 = vadd.f32 %v925_v3, %v3000_v40  ;;  %v2375_v5 = vpop.f32.mrb[42].mxu1  ;;  %2448 = vmatprep.mubr.bf16.mxu0 %v1102_v0 }
 0x222   :  { %v937_v6 = vadd.f32 %v2375_v5, %v3000_v40  ;;  %v928_v7 = vpop.f32.mrb[43].mxu1  ;;  %2449 = vmatmul.mubr.bf16.gmra.mrb[100].mxu0 %v1103_v63  ;;  %v1062_v9 = vmax.f32 %v934_v2, 0.0 }
 0x223   :  { %v929_v8 = vadd.f32 %v928_v7, %v3000_v40  ;;  %v1060_v11 = vmax.f32 %v926_v4, 0.0 }
 0x224   :  { %v1063_v10 = vmax.f32 %v937_v6, 0.0 }
 0x225   :  { %v1061_v12 = vmax.f32 %v929_v8, 0.0 }
 0x226   :  { %v1105_v13 = vpack.c.bf16 %v1063_v10, %v1062_v9 }
 0x227   :  { %v1104_v14 = vpack.c.bf16 %v1061_v12, %v1060_v11  ;;  %v2378_v15 = vpop.f32.mrb[44].mxu1 }
 0x228   :  { %v950_v16 = vadd.f32 %v2378_v15, %v3000_v40  ;;  %v941_v17 = vpop.f32.mrb[45].mxu1 }
 0x229   :  { %v942_v18 = vadd.f32 %v941_v17, %v3000_v40  ;;  %v2379_v19 = vpop.f32.mrb[46].mxu1  ;;  %2452 = vmatprep.mubr.bf16.mxu0 %v1104_v14 }
 0x22a   :  { %v953_v20 = vadd.f32 %v2379_v19, %v3000_v40  ;;  %v944_v21 = vpop.f32.mrb[47].mxu1  ;;  %2453 = vmatmul.mubr.bf16.gmra.mrb[104].mxu0 %v1105_v13  ;;  %v1066_v23 = vmax.f32 %v950_v16, 0.0 }
 0x22b   :  { %v945_v22 = vadd.f32 %v944_v21, %v3000_v40  ;;  %v1064_v25 = vmax.f32 %v942_v18, 0.0 }
 0x22c   :  { %v1067_v24 = vmax.f32 %v953_v20, 0.0 }
 0x22d   :  { %v1065_v26 = vmax.f32 %v945_v22, 0.0 }
 0x22e   :  { %v1107_v27 = vpack.c.bf16 %v1067_v24, %v1066_v23  ;;  %v1135_v23 = vsub.s32 2, %v2896_v50  ;;  %v2588_v24 = vld [vmem:[%s3482_s3] sm:$0x7] }
 0x22f   :  { %v1106_v28 = vpack.c.bf16 %v1065_v26, %v1064_v25  ;;  %v2382_v29 = vpop.f32.mrb[48].mxu1 }
 0x230   :  { %v966_v30 = vadd.f32 %v2382_v29, %v3000_v40  ;;  %v957_v31 = vpop.f32.mrb[49].mxu1  ;;  %v3088_v25 = vrot.slane %v2588_v24, %v1135_v23 }
 0x231   :  { %v958_v32 = vadd.f32 %v957_v31, %v3000_v40  ;;  %v2383_v33 = vpop.f32.mrb[50].mxu1  ;;  %2456 = vmatprep.mubr.bf16.mxu0 %v1106_v28 }
 0x232   :  { %v969_v34 = vadd.f32 %v2383_v33, %v3000_v40  ;;  %v960_v35 = vpop.f32.mrb[51].mxu1  ;;  %2457 = vmatmul.mubr.bf16.gmra.mrb[108].mxu0 %v1107_v27  ;;  %v1070_v37 = vmax.f32 %v966_v30, 0.0 }
 0x233   :  { %v961_v36 = vadd.f32 %v960_v35, %v3000_v40  ;;  %v1068_v39 = vmax.f32 %v958_v32, 0.0 }
 0x234   :  { %v1071_v38 = vmax.f32 %v969_v34, 0.0 }
 0x235   :  { %v1069_v54 = vmax.f32 %v961_v36, 0.0 }
 0x236   :  { %v1109_v41 = vpack.c.bf16 %v1071_v38, %v1070_v37 }
 0x237   :  { %v1108_v42 = vpack.c.bf16 %v1069_v54, %v1068_v39  ;;  %v2386_v43 = vpop.f32.mrb[52].mxu1 }
 0x238   :  { %v982_v44 = vadd.f32 %v2386_v43, %v3000_v40  ;;  %v973_v45 = vpop.f32.mrb[53].mxu1 }
 0x239   :  { %v974_v46 = vadd.f32 %v973_v45, %v3000_v40  ;;  %v2387_v47 = vpop.f32.mrb[54].mxu1  ;;  %2460 = vmatprep.mubr.bf16.mxu0 %v1108_v42 }
 0x23a   :  { %v985_v48 = vadd.f32 %v2387_v47, %v3000_v40  ;;  %v976_v52 = vpop.f32.mrb[55].mxu1  ;;  %2461 = vmatmul.mubr.bf16.gmra.mrb[112].mxu0 %v1109_v41  ;;  %v1074_v51 = vmax.f32 %v982_v44, 0.0 }
 0x23b   :  { %v977_v49 = vadd.f32 %v976_v52, %v3000_v40  ;;  %v1072_v55 = vmax.f32 %v974_v46, 0.0 }
 0x23c   :  { %v1075_v53 = vmax.f32 %v985_v48, 0.0 }
 0x23d   :  { %v1073_v56 = vmax.f32 %v977_v49, 0.0 }
 0x23e   :  { %v1111_v57 = vpack.c.bf16 %v1075_v53, %v1074_v51 }
 0x23f   :  { %v1110_v58 = vpack.c.bf16 %v1073_v56, %v1072_v55  ;;  %v2390_v59 = vpop.f32.mrb[56].mxu1 }
 0x240   :  { %v998_v60 = vadd.f32 %v2390_v59, %v3000_v40  ;;  %v989_v61 = vpop.f32.mrb[57].mxu1 }
 0x241   :  { %v990_v62 = vadd.f32 %v989_v61, %v3000_v40  ;;  %v2391_v63 = vpop.f32.mrb[58].mxu1  ;;  %2464 = vmatprep.mubr.bf16.mxu0 %v1110_v58 }
 0x242   :  { %v1001_v0 = vadd.f32 %v2391_v63, %v3000_v40  ;;  %v992_v1 = vpop.f32.mrb[59].mxu1  ;;  %2465 = vmatmul.mubr.bf16.gmra.mrb[116].mxu0 %v1111_v57  ;;  %v1078_v3 = vmax.f32 %v998_v60, 0.0 }
 0x243   :  { %v993_v2 = vadd.f32 %v992_v1, %v3000_v40  ;;  %v1076_v5 = vmax.f32 %v990_v62, 0.0 }
 0x244   :  { %v1079_v4 = vmax.f32 %v1001_v0, 0.0 }
 0x245   :  { %v1077_v6 = vmax.f32 %v993_v2, 0.0 }
 0x246   :  { %v1113_v7 = vpack.c.bf16 %v1079_v4, %v1078_v3 }
 0x247   :  { %v1112_v8 = vpack.c.bf16 %v1077_v6, %v1076_v5  ;;  %v2394_v9 = vpop.f32.mrb[60].mxu1 }
 0x248   :  { %v1014_v10 = vadd.f32 %v2394_v9, %v3000_v40  ;;  %v1005_v11 = vpop.f32.mrb[61].mxu1 }
 0x249   :  { %v1006_v12 = vadd.f32 %v1005_v11, %v3000_v40  ;;  %v2395_v13 = vpop.f32.mrb[62].mxu1  ;;  %2468 = vmatprep.mubr.bf16.mxu0 %v1112_v8 }
 0x24a   :  { %v1017_v14 = vadd.f32 %v2395_v13, %v3000_v40  ;;  %v1008_v15 = vpop.f32.mrb[63].mxu1  ;;  %2469 = vmatmul.mubr.bf16.gmra.mrb[120].mxu0 %v1113_v7  ;;  %v1082_v17 = vmax.f32 %v1014_v10, 0.0 }
 0x24b   :  { %v1009_v16 = vadd.f32 %v1008_v15, %v3000_v40  ;;  %v1080_v19 = vmax.f32 %v1006_v12, 0.0 }
 0x24c   :  { %v1083_v18 = vmax.f32 %v1017_v14, 0.0 }
 0x24d   :  { %v1081_v20 = vmax.f32 %v1009_v16, 0.0 }
 0x24e   :  { %v1115_v21 = vpack.c.bf16 %v1083_v18, %v1082_v17 }
 0x24f   :  { %v1114_v22 = vpack.c.bf16 %v1081_v20, %v1080_v19 }
 0x251   :  { %2472 = vmatprep.mubr.bf16.mxu0 %v1114_v22 }
 0x252   :  { %2473 = vmatmul.mubr.bf16.gmra.mrb[124].mxu0 %v1115_v21 }
 0x2ad   :  { %v2414_v26 = vpop.f32.mrb[64].mxu0 }
 0x2ae   :  { %v1228_v27 = vadd.f32 %v2414_v26, %v3088_v25  ;;  %v1219_v40 = vpop.f32.mrb[65].mxu0 }
 0x2af   :  { %v1220_v28 = vadd.f32 %v1219_v40, %v3088_v25  ;;  %v2415_v29 = vpop.f32.mrb[66].mxu0 }
 0x2b0   :  { %v1231_v30 = vadd.f32 %v2415_v29, %v3088_v25  ;;  %v1222_v31 = vpop.f32.mrb[67].mxu0  ;;  %v1476_v33 = vmax.f32 %v1228_v27, 0.0 }
 0x2b1   :  { %v1223_v32 = vadd.f32 %v1222_v31, %v3088_v25  ;;  %v1474_v34 = vmax.f32 %v1220_v28, 0.0 }
 0x2b2   :  { %v1477_v50 = vmax.f32 %v1231_v30, 0.0 }
 0x2b3   :  { %v1475_v35 = vmax.f32 %v1223_v32, 0.0 }
 0x2b4   :  { %v1539_v36 = vpack.c.bf16 %v1477_v50, %v1476_v33 }
 0x2b5   :  { %v1538_v37 = vpack.c.bf16 %v1475_v35, %v1474_v34  ;;  %v2418_v38 = vpop.f32.mrb[68].mxu0 }
 0x2b6   :  { %v1244_v39 = vadd.f32 %v2418_v38, %v3088_v25  ;;  %v1235_v54 = vpop.f32.mrb[69].mxu0 }
 0x2b7   :  { %v1236_v41 = vadd.f32 %v1235_v54, %v3088_v25  ;;  %v2419_v42 = vpop.f32.mrb[70].mxu0  ;;  %2492 = vmatprep.mubr.bf16.mxu1 %v1538_v37 }
 0x2b8   :  { %v1247_v43 = vadd.f32 %v2419_v42, %v3088_v25  ;;  %v1238_v44 = vpop.f32.mrb[71].mxu0  ;;  %2493 = vmatmul.mubr.bf16.vlgmr.msra.gmra.mrb[64].mxu1 %v1539_v36  ;;  %v1480_v46 = vmax.f32 %v1244_v39, 0.0 }
 0x2b9   :  { %v1239_v45 = vadd.f32 %v1238_v44, %v3088_v25  ;;  %v1478_v48 = vmax.f32 %v1236_v41, 0.0 }
 0x2ba   :  { %v1481_v47 = vmax.f32 %v1247_v43, 0.0 }
 0x2bb   :  { %v1479_v52 = vmax.f32 %v1239_v45, 0.0 }
 0x2bc   :  { %v1541_v49 = vpack.c.bf16 %v1481_v47, %v1480_v46 }
 0x2bd   :  { %v1540_v51 = vpack.c.bf16 %v1479_v52, %v1478_v48  ;;  %v2422_v53 = vpop.f32.mrb[72].mxu0 }
 0x2be   :  { %v1260_v55 = vadd.f32 %v2422_v53, %v3088_v25  ;;  %v1251_v56 = vpop.f32.mrb[73].mxu0 }
 0x2bf   :  { %v1252_v57 = vadd.f32 %v1251_v56, %v3088_v25  ;;  %v2423_v58 = vpop.f32.mrb[74].mxu0  ;;  %2496 = vmatprep.mubr.bf16.mxu1 %v1540_v51 }
 0x2c0   :  { %v1263_v59 = vadd.f32 %v2423_v58, %v3088_v25  ;;  %v1254_v60 = vpop.f32.mrb[75].mxu0  ;;  %2497 = vmatmul.mubr.bf16.gmra.mrb[68].mxu1 %v1541_v49  ;;  %v1484_v62 = vmax.f32 %v1260_v55, 0.0 }
 0x2c1   :  { %v1255_v61 = vadd.f32 %v1254_v60, %v3088_v25  ;;  %v1482_v0 = vmax.f32 %v1252_v57, 0.0 }
 0x2c2   :  { %v1485_v63 = vmax.f32 %v1263_v59, 0.0 }
 0x2c3   :  { %v1483_v1 = vmax.f32 %v1255_v61, 0.0 }
 0x2c4   :  { %v1543_v2 = vpack.c.bf16 %v1485_v63, %v1484_v62 }
 0x2c5   :  { %v1542_v3 = vpack.c.bf16 %v1483_v1, %v1482_v0  ;;  %v2426_v4 = vpop.f32.mrb[76].mxu0 }
 0x2c6   :  { %v1276_v5 = vadd.f32 %v2426_v4, %v3088_v25  ;;  %v1267_v6 = vpop.f32.mrb[77].mxu0 }
 0x2c7   :  { %v1268_v7 = vadd.f32 %v1267_v6, %v3088_v25  ;;  %v2427_v8 = vpop.f32.mrb[78].mxu0  ;;  %2500 = vmatprep.mubr.bf16.mxu1 %v1542_v3 }
 0x2c8   :  { %v1279_v9 = vadd.f32 %v2427_v8, %v3088_v25  ;;  %v1270_v10 = vpop.f32.mrb[79].mxu0  ;;  %2501 = vmatmul.mubr.bf16.gmra.mrb[72].mxu1 %v1543_v2  ;;  %v1488_v12 = vmax.f32 %v1276_v5, 0.0 }
 0x2c9   :  { %v1271_v11 = vadd.f32 %v1270_v10, %v3088_v25  ;;  %v1486_v14 = vmax.f32 %v1268_v7, 0.0 }
 0x2ca   :  { %v1489_v13 = vmax.f32 %v1279_v9, 0.0 }
 0x2cb   :  { %v1487_v15 = vmax.f32 %v1271_v11, 0.0 }
 0x2cc   :  { %v1545_v16 = vpack.c.bf16 %v1489_v13, %v1488_v12 }
 0x2cd   :  { %v1544_v17 = vpack.c.bf16 %v1487_v15, %v1486_v14  ;;  %v2430_v18 = vpop.f32.mrb[80].mxu0 }
 0x2ce   :  { %v1292_v19 = vadd.f32 %v2430_v18, %v3088_v25  ;;  %v1283_v20 = vpop.f32.mrb[81].mxu0 }
 0x2cf   :  { %v1284_v21 = vadd.f32 %v1283_v20, %v3088_v25  ;;  %v2431_v22 = vpop.f32.mrb[82].mxu0  ;;  %2504 = vmatprep.mubr.bf16.mxu1 %v1544_v17 }
 0x2d0   :  { %v1295_v23 = vadd.f32 %v2431_v22, %v3088_v25  ;;  %v1286_v24 = vpop.f32.mrb[83].mxu0  ;;  %2505 = vmatmul.mubr.bf16.gmra.mrb[76].mxu1 %v1545_v16  ;;  %v1492_v27 = vmax.f32 %v1292_v19, 0.0 }
 0x2d1   :  { %v1287_v26 = vadd.f32 %v1286_v24, %v3088_v25  ;;  %v1490_v28 = vmax.f32 %v1284_v21, 0.0 }
 0x2d2   :  { %v1493_v40 = vmax.f32 %v1295_v23, 0.0 }
 0x2d3   :  { %v1491_v29 = vmax.f32 %v1287_v26, 0.0 }
 0x2d4   :  { %v1547_v30 = vpack.c.bf16 %v1493_v40, %v1492_v27 }
 0x2d5   :  { %v1546_v31 = vpack.c.bf16 %v1491_v29, %v1490_v28  ;;  %v2434_v32 = vpop.f32.mrb[84].mxu0 }
 0x2d6   :  { %v1308_v33 = vadd.f32 %v2434_v32, %v3088_v25  ;;  %v1299_v50 = vpop.f32.mrb[85].mxu0 }
 0x2d7   :  { %v1300_v34 = vadd.f32 %v1299_v50, %v3088_v25  ;;  %v2435_v35 = vpop.f32.mrb[86].mxu0  ;;  %2508 = vmatprep.mubr.bf16.mxu1 %v1546_v31 }
 0x2d8   :  { %v1311_v36 = vadd.f32 %v2435_v35, %v3088_v25  ;;  %v1302_v37 = vpop.f32.mrb[87].mxu0  ;;  %2509 = vmatmul.mubr.bf16.gmra.mrb[80].mxu1 %v1547_v30  ;;  %v1496_v39 = vmax.f32 %v1308_v33, 0.0 }
 0x2d9   :  { %v1303_v38 = vadd.f32 %v1302_v37, %v3088_v25  ;;  %v1494_v41 = vmax.f32 %v1300_v34, 0.0 }
 0x2da   :  { %v1497_v54 = vmax.f32 %v1311_v36, 0.0 }
 0x2db   :  { %v1495_v42 = vmax.f32 %v1303_v38, 0.0 }
 0x2dc   :  { %v1549_v43 = vpack.c.bf16 %v1497_v54, %v1496_v39 }
 0x2dd   :  { %v1548_v44 = vpack.c.bf16 %v1495_v42, %v1494_v41  ;;  %v2438_v45 = vpop.f32.mrb[88].mxu0 }
 0x2de   :  { %v1324_v46 = vadd.f32 %v2438_v45, %v3088_v25  ;;  %v1315_v47 = vpop.f32.mrb[89].mxu0 }
 0x2df   :  { %v1316_v48 = vadd.f32 %v1315_v47, %v3088_v25  ;;  %v2439_v52 = vpop.f32.mrb[90].mxu0  ;;  %2512 = vmatprep.mubr.bf16.mxu1 %v1548_v44 }
 0x2e0   :  { %v1327_v49 = vadd.f32 %v2439_v52, %v3088_v25  ;;  %v1318_v51 = vpop.f32.mrb[91].mxu0  ;;  %2513 = vmatmul.mubr.bf16.gmra.mrb[84].mxu1 %v1549_v43  ;;  %v1500_v55 = vmax.f32 %v1324_v46, 0.0 }
 0x2e1   :  { %v1319_v53 = vadd.f32 %v1318_v51, %v3088_v25  ;;  %v1498_v57 = vmax.f32 %v1316_v48, 0.0 }
 0x2e2   :  { %v1501_v56 = vmax.f32 %v1327_v49, 0.0 }
 0x2e3   :  { %v1499_v58 = vmax.f32 %v1319_v53, 0.0 }
 0x2e4   :  { %v1551_v59 = vpack.c.bf16 %v1501_v56, %v1500_v55 }
 0x2e5   :  { %v1550_v60 = vpack.c.bf16 %v1499_v58, %v1498_v57  ;;  %v2442_v61 = vpop.f32.mrb[92].mxu0 }
 0x2e6   :  { %v1340_v62 = vadd.f32 %v2442_v61, %v3088_v25  ;;  %v1331_v63 = vpop.f32.mrb[93].mxu0 }
 0x2e7   :  { %v1332_v0 = vadd.f32 %v1331_v63, %v3088_v25  ;;  %v2443_v1 = vpop.f32.mrb[94].mxu0  ;;  %2516 = vmatprep.mubr.bf16.mxu1 %v1550_v60 }
 0x2e8   :  { %v1343_v2 = vadd.f32 %v2443_v1, %v3088_v25  ;;  %v1334_v3 = vpop.f32.mrb[95].mxu0  ;;  %2517 = vmatmul.mubr.bf16.gmra.mrb[88].mxu1 %v1551_v59  ;;  %v1504_v5 = vmax.f32 %v1340_v62, 0.0 }
 0x2e9   :  { %v1335_v4 = vadd.f32 %v1334_v3, %v3088_v25  ;;  %v1502_v7 = vmax.f32 %v1332_v0, 0.0 }
 0x2ea   :  { %v1505_v6 = vmax.f32 %v1343_v2, 0.0 }
 0x2eb   :  { %v1503_v8 = vmax.f32 %v1335_v4, 0.0 }
 0x2ec   :  { %v1553_v9 = vpack.c.bf16 %v1505_v6, %v1504_v5 }
 0x2ed   :  { %v1552_v10 = vpack.c.bf16 %v1503_v8, %v1502_v7  ;;  %v2446_v11 = vpop.f32.mrb[96].mxu0 }
 0x2ee   :  { %v1356_v12 = vadd.f32 %v2446_v11, %v3088_v25  ;;  %v1347_v13 = vpop.f32.mrb[97].mxu0 }
 0x2ef   :  { %v1348_v14 = vadd.f32 %v1347_v13, %v3088_v25  ;;  %v2447_v15 = vpop.f32.mrb[98].mxu0  ;;  %2520 = vmatprep.mubr.bf16.mxu1 %v1552_v10 }
 0x2f0   :  { %v1359_v16 = vadd.f32 %v2447_v15, %v3088_v25  ;;  %v1350_v17 = vpop.f32.mrb[99].mxu0  ;;  %2521 = vmatmul.mubr.bf16.gmra.mrb[92].mxu1 %v1553_v9  ;;  %v1508_v19 = vmax.f32 %v1356_v12, 0.0 }
 0x2f1   :  { %v1351_v18 = vadd.f32 %v1350_v17, %v3088_v25  ;;  %v1506_v21 = vmax.f32 %v1348_v14, 0.0 }
 0x2f2   :  { %v1509_v20 = vmax.f32 %v1359_v16, 0.0 }
 0x2f3   :  { %v1507_v22 = vmax.f32 %v1351_v18, 0.0 }
 0x2f4   :  { %v1555_v23 = vpack.c.bf16 %v1509_v20, %v1508_v19 }
 0x2f5   :  { %v1554_v24 = vpack.c.bf16 %v1507_v22, %v1506_v21  ;;  %v2450_v26 = vpop.f32.mrb[100].mxu0 }
 0x2f6   :  { %v1372_v27 = vadd.f32 %v2450_v26, %v3088_v25  ;;  %v1363_v40 = vpop.f32.mrb[101].mxu0 }
 0x2f7   :  { %v1364_v28 = vadd.f32 %v1363_v40, %v3088_v25  ;;  %v2451_v29 = vpop.f32.mrb[102].mxu0  ;;  %2524 = vmatprep.mubr.bf16.mxu1 %v1554_v24 }
 0x2f8   :  { %v1375_v30 = vadd.f32 %v2451_v29, %v3088_v25  ;;  %v1366_v31 = vpop.f32.mrb[103].mxu0  ;;  %2525 = vmatmul.mubr.bf16.gmra.mrb[96].mxu1 %v1555_v23  ;;  %v1512_v33 = vmax.f32 %v1372_v27, 0.0 }
 0x2f9   :  { %v1367_v32 = vadd.f32 %v1366_v31, %v3088_v25  ;;  %v1510_v34 = vmax.f32 %v1364_v28, 0.0 }
 0x2fa   :  { %v1513_v50 = vmax.f32 %v1375_v30, 0.0 }
 0x2fb   :  { %v1511_v35 = vmax.f32 %v1367_v32, 0.0 }
 0x2fc   :  { %v1557_v36 = vpack.c.bf16 %v1513_v50, %v1512_v33 }
 0x2fd   :  { %v1556_v37 = vpack.c.bf16 %v1511_v35, %v1510_v34  ;;  %v2454_v38 = vpop.f32.mrb[104].mxu0 }
 0x2fe   :  { %v1388_v39 = vadd.f32 %v2454_v38, %v3088_v25  ;;  %v1379_v54 = vpop.f32.mrb[105].mxu0 }
 0x2ff   :  { %v1380_v41 = vadd.f32 %v1379_v54, %v3088_v25  ;;  %v2455_v42 = vpop.f32.mrb[106].mxu0  ;;  %2528 = vmatprep.mubr.bf16.mxu1 %v1556_v37 }
 0x300   :  { %v1391_v43 = vadd.f32 %v2455_v42, %v3088_v25  ;;  %v1382_v44 = vpop.f32.mrb[107].mxu0  ;;  %2529 = vmatmul.mubr.bf16.gmra.mrb[100].mxu1 %v1557_v36  ;;  %v1516_v46 = vmax.f32 %v1388_v39, 0.0 }
 0x301   :  { %v1383_v45 = vadd.f32 %v1382_v44, %v3088_v25  ;;  %v1514_v48 = vmax.f32 %v1380_v41, 0.0 }
 0x302   :  { %v1517_v47 = vmax.f32 %v1391_v43, 0.0 }
 0x303   :  { %v1515_v52 = vmax.f32 %v1383_v45, 0.0 }
 0x304   :  { %v1559_v49 = vpack.c.bf16 %v1517_v47, %v1516_v46 }
 0x305   :  { %v1558_v51 = vpack.c.bf16 %v1515_v52, %v1514_v48  ;;  %v2458_v53 = vpop.f32.mrb[108].mxu0 }
 0x306   :  { %v1404_v55 = vadd.f32 %v2458_v53, %v3088_v25  ;;  %v1395_v56 = vpop.f32.mrb[109].mxu0 }
 0x307   :  { %v1396_v57 = vadd.f32 %v1395_v56, %v3088_v25  ;;  %v2459_v58 = vpop.f32.mrb[110].mxu0  ;;  %2532 = vmatprep.mubr.bf16.mxu1 %v1558_v51 }
 0x308   :  { %v1407_v59 = vadd.f32 %v2459_v58, %v3088_v25  ;;  %v1398_v60 = vpop.f32.mrb[111].mxu0  ;;  %2533 = vmatmul.mubr.bf16.gmra.mrb[104].mxu1 %v1559_v49  ;;  %v1520_v62 = vmax.f32 %v1404_v55, 0.0 }
 0x309   :  { %v1399_v61 = vadd.f32 %v1398_v60, %v3088_v25  ;;  %v1518_v0 = vmax.f32 %v1396_v57, 0.0 }
 0x30a   :  { %v1521_v63 = vmax.f32 %v1407_v59, 0.0 }
 0x30b   :  { %v1519_v1 = vmax.f32 %v1399_v61, 0.0  ;;  %v3157_v61 = vld [vmem:[%s3484_s5] ss:$0 sm:$0xff] }
 0x30c   :  { %v1561_v2 = vpack.c.bf16 %v1521_v63, %v1520_v62 }
 0x30d   :  { %v1560_v3 = vpack.c.bf16 %v1519_v1, %v1518_v0  ;;  %v2462_v4 = vpop.f32.mrb[112].mxu0 }
 0x30e   :  { %v1420_v5 = vadd.f32 %v2462_v4, %v3088_v25  ;;  %v1411_v6 = vpop.f32.mrb[113].mxu0 }
 0x30f   :  { %v1412_v7 = vadd.f32 %v1411_v6, %v3088_v25  ;;  %v2463_v8 = vpop.f32.mrb[114].mxu0  ;;  %2536 = vmatprep.mubr.bf16.mxu1 %v1560_v3 }
 0x310   :  { %v1423_v9 = vadd.f32 %v2463_v8, %v3088_v25  ;;  %v1414_v10 = vpop.f32.mrb[115].mxu0  ;;  %2537 = vmatmul.mubr.bf16.gmra.mrb[108].mxu1 %v1561_v2  ;;  %v1524_v12 = vmax.f32 %v1420_v5, 0.0 }
 0x311   :  { %v1415_v11 = vadd.f32 %v1414_v10, %v3088_v25  ;;  %v1522_v14 = vmax.f32 %v1412_v7, 0.0 }
 0x312   :  { %v1525_v13 = vmax.f32 %v1423_v9, 0.0 }
 0x313   :  { %v1523_v15 = vmax.f32 %v1415_v11, 0.0 }
 0x314   :  { %v1563_v16 = vpack.c.bf16 %v1525_v13, %v1524_v12 }
 0x315   :  { %v1562_v17 = vpack.c.bf16 %v1523_v15, %v1522_v14  ;;  %v2466_v18 = vpop.f32.mrb[116].mxu0 }
 0x316   :  { %v1436_v19 = vadd.f32 %v2466_v18, %v3088_v25  ;;  %v1427_v20 = vpop.f32.mrb[117].mxu0 }
 0x317   :  { %v1428_v21 = vadd.f32 %v1427_v20, %v3088_v25  ;;  %v2467_v22 = vpop.f32.mrb[118].mxu0  ;;  %2540 = vmatprep.mubr.bf16.mxu1 %v1562_v17 }
 0x318   :  { %v1439_v23 = vadd.f32 %v2467_v22, %v3088_v25  ;;  %v1430_v24 = vpop.f32.mrb[119].mxu0  ;;  %2541 = vmatmul.mubr.bf16.gmra.mrb[112].mxu1 %v1563_v16  ;;  %v1528_v27 = vmax.f32 %v1436_v19, 0.0 }
 0x319   :  { %v1431_v26 = vadd.f32 %v1430_v24, %v3088_v25  ;;  %v1526_v28 = vmax.f32 %v1428_v21, 0.0 }
 0x31a   :  { %v1529_v40 = vmax.f32 %v1439_v23, 0.0 }
 0x31b   :  { %v1527_v29 = vmax.f32 %v1431_v26, 0.0 }
 0x31c   :  { %v1565_v30 = vpack.c.bf16 %v1529_v40, %v1528_v27 }
 0x31d   :  { %v1564_v31 = vpack.c.bf16 %v1527_v29, %v1526_v28  ;;  %v2470_v32 = vpop.f32.mrb[120].mxu0 }
 0x31e   :  { %v1452_v33 = vadd.f32 %v2470_v32, %v3088_v25  ;;  %v1443_v50 = vpop.f32.mrb[121].mxu0 }
 0x31f   :  { %v1444_v34 = vadd.f32 %v1443_v50, %v3088_v25  ;;  %v2471_v35 = vpop.f32.mrb[122].mxu0  ;;  %2544 = vmatprep.mubr.bf16.mxu1 %v1564_v31 }
 0x320   :  { %v1455_v36 = vadd.f32 %v2471_v35, %v3088_v25  ;;  %v1446_v37 = vpop.f32.mrb[123].mxu0  ;;  %2545 = vmatmul.mubr.bf16.gmra.mrb[116].mxu1 %v1565_v30  ;;  %v1532_v39 = vmax.f32 %v1452_v33, 0.0 }
 0x321   :  { %v1447_v38 = vadd.f32 %v1446_v37, %v3088_v25  ;;  %v1530_v41 = vmax.f32 %v1444_v34, 0.0 }
 0x322   :  { %v1533_v54 = vmax.f32 %v1455_v36, 0.0 }
 0x323   :  { %v1531_v42 = vmax.f32 %v1447_v38, 0.0 }
 0x324   :  { %v1567_v43 = vpack.c.bf16 %v1533_v54, %v1532_v39 }
 0x325   :  { %v1566_v44 = vpack.c.bf16 %v1531_v42, %v1530_v41  ;;  %v2474_v45 = vpop.f32.mrb[124].mxu0 }
 0x326   :  { %v1468_v46 = vadd.f32 %v2474_v45, %v3088_v25  ;;  %v1459_v47 = vpop.f32.mrb[125].mxu0 }
 0x327   :  { %v1460_v48 = vadd.f32 %v1459_v47, %v3088_v25  ;;  %v2475_v52 = vpop.f32.mrb[126].mxu0  ;;  %2548 = vmatprep.mubr.bf16.mxu1 %v1566_v44 }
 0x328   :  { %v1471_v49 = vadd.f32 %v2475_v52, %v3088_v25  ;;  %v1462_v51 = vpop.f32.mrb[127].mxu0  ;;  %2549 = vmatmul.mubr.bf16.gmra.mrb[120].mxu1 %v1567_v43  ;;  %v1536_v55 = vmax.f32 %v1468_v46, 0.0 }
 0x329   :  { %v1463_v53 = vadd.f32 %v1462_v51, %v3088_v25  ;;  %v1534_v57 = vmax.f32 %v1460_v48, 0.0 }
 0x32a   :  { %v1537_v56 = vmax.f32 %v1471_v49, 0.0 }
 0x32b   :  { %v1535_v58 = vmax.f32 %v1463_v53, 0.0 }
 0x32c   :  { %v1569_v59 = vpack.c.bf16 %v1537_v56, %v1536_v55 }
 0x32d   :  { %v1568_v60 = vpack.c.bf16 %v1535_v58, %v1534_v57 }
 0x32f   :  { %2552 = vmatprep.mubr.bf16.mxu1 %v1568_v60 }
 0x330   :  { %2553 = vmatmul.mubr.bf16.gmra.mrb[124].mxu1 %v1569_v59 }
 0x38b   :  { %v2494_v62 = vpop.f32.mrb[64].mxu1 }
 0x38c   :  { %v1684_v63 = vadd.f32 %v2494_v62, %v3157_v61  ;;  %v1675_v0 = vpop.f32.mrb[65].mxu1 }
 0x38d   :  { %v1676_v25 = vadd.f32 %v3157_v61, %v1675_v0  ;;  %v2495_v1 = vpop.f32.mrb[66].mxu1 }
 0x38e   :  { %1933 = vst.msk [vmem:[%s3485_s6 + $0x10] sm:$0xff] %vm1930_vm2, %v1684_v63  ;;  %v1687_v2 = vadd.f32 %v2495_v1, %v3157_v61  ;;  %v1678_v3 = vpop.f32.mrb[67].mxu1 }
 0x38f   :  { %1931 = vst.msk [vmem:[%s3485_s6] sm:$0xff] %vm1930_vm2, %v1676_v25  ;;  %v1679_v4 = vadd.f32 %v3157_v61, %v1678_v3 }
 0x390   :  { %1934 = vst.msk [vmem:[%s3485_s6 + $0x18] sm:$0xff] %vm1930_vm2, %v1687_v2 }
 0x391   :  { %1932 = vst.msk [vmem:[%s3485_s6 + $0x8] sm:$0xff] %vm1930_vm2, %v1679_v4 }
 0x393   :  { %v2498_v5 = vpop.f32.mrb[68].mxu1 }
 0x394   :  { %v1700_v6 = vadd.f32 %v2498_v5, %v3157_v61  ;;  %v1691_v7 = vpop.f32.mrb[69].mxu1 }
 0x395   :  { %v1692_v8 = vadd.f32 %v3157_v61, %v1691_v7  ;;  %v2499_v9 = vpop.f32.mrb[70].mxu1 }
 0x396   :  { %1937 = vst.msk [vmem:[%s3485_s6 + $0x30] sm:$0xff] %vm1930_vm2, %v1700_v6  ;;  %v1703_v10 = vadd.f32 %v2499_v9, %v3157_v61  ;;  %v1694_v11 = vpop.f32.mrb[71].mxu1 }
 0x397   :  { %1935 = vst.msk [vmem:[%s3485_s6 + $0x20] sm:$0xff] %vm1930_vm2, %v1692_v8  ;;  %v1695_v12 = vadd.f32 %v3157_v61, %v1694_v11 }
 0x398   :  { %1938 = vst.msk [vmem:[%s3485_s6 + $0x38] sm:$0xff] %vm1930_vm2, %v1703_v10 }
 0x399   :  { %1936 = vst.msk [vmem:[%s3485_s6 + $0x28] sm:$0xff] %vm1930_vm2, %v1695_v12 }
 0x39b   :  { %v2502_v13 = vpop.f32.mrb[72].mxu1 }
 0x39c   :  { %v1716_v14 = vadd.f32 %v2502_v13, %v3157_v61  ;;  %v1707_v15 = vpop.f32.mrb[73].mxu1 }
 0x39d   :  { %v1708_v16 = vadd.f32 %v3157_v61, %v1707_v15  ;;  %v2503_v17 = vpop.f32.mrb[74].mxu1 }
 0x39e   :  { %1941 = vst.msk [vmem:[%s3485_s6 + $0x50] sm:$0xff] %vm1930_vm2, %v1716_v14  ;;  %v1719_v18 = vadd.f32 %v2503_v17, %v3157_v61  ;;  %v1710_v19 = vpop.f32.mrb[75].mxu1 }
 0x39f   :  { %1939 = vst.msk [vmem:[%s3485_s6 + $0x40] sm:$0xff] %vm1930_vm2, %v1708_v16  ;;  %v1711_v20 = vadd.f32 %v3157_v61, %v1710_v19 }
 0x3a0   :  { %1942 = vst.msk [vmem:[%s3485_s6 + $0x58] sm:$0xff] %vm1930_vm2, %v1719_v18 }
 0x3a1   :  { %1940 = vst.msk [vmem:[%s3485_s6 + $0x48] sm:$0xff] %vm1930_vm2, %v1711_v20 }
 0x3a3   :  { %v2506_v21 = vpop.f32.mrb[76].mxu1 }
 0x3a4   :  { %v1732_v22 = vadd.f32 %v2506_v21, %v3157_v61  ;;  %v1723_v23 = vpop.f32.mrb[77].mxu1 }
 0x3a5   :  { %v1724_v24 = vadd.f32 %v3157_v61, %v1723_v23  ;;  %v2507_v26 = vpop.f32.mrb[78].mxu1 }
 0x3a6   :  { %1945 = vst.msk [vmem:[%s3485_s6 + $0x70] sm:$0xff] %vm1930_vm2, %v1732_v22  ;;  %v1735_v27 = vadd.f32 %v2507_v26, %v3157_v61  ;;  %v1726_v40 = vpop.f32.mrb[79].mxu1 }
 0x3a7   :  { %1943 = vst.msk [vmem:[%s3485_s6 + $0x60] sm:$0xff] %vm1930_vm2, %v1724_v24  ;;  %v1727_v28 = vadd.f32 %v3157_v61, %v1726_v40 }
 0x3a8   :  { %1946 = vst.msk [vmem:[%s3485_s6 + $0x78] sm:$0xff] %vm1930_vm2, %v1735_v27 }
 0x3a9   :  { %1944 = vst.msk [vmem:[%s3485_s6 + $0x68] sm:$0xff] %vm1930_vm2, %v1727_v28 }
 0x3ab   :  { %v2510_v29 = vpop.f32.mrb[80].mxu1 }
 0x3ac   :  { %v1748_v30 = vadd.f32 %v2510_v29, %v3157_v61  ;;  %v1739_v31 = vpop.f32.mrb[81].mxu1 }
 0x3ad   :  { %v1740_v32 = vadd.f32 %v3157_v61, %v1739_v31  ;;  %v2511_v33 = vpop.f32.mrb[82].mxu1 }
 0x3ae   :  { %1949 = vst.msk [vmem:[%s3485_s6 + $0x90] sm:$0xff] %vm1930_vm2, %v1748_v30  ;;  %v1751_v50 = vadd.f32 %v2511_v33, %v3157_v61  ;;  %v1742_v34 = vpop.f32.mrb[83].mxu1 }
 0x3af   :  { %1947 = vst.msk [vmem:[%s3485_s6 + $0x80] sm:$0xff] %vm1930_vm2, %v1740_v32  ;;  %v1743_v35 = vadd.f32 %v3157_v61, %v1742_v34 }
 0x3b0   :  { %1950 = vst.msk [vmem:[%s3485_s6 + $0x98] sm:$0xff] %vm1930_vm2, %v1751_v50 }
 0x3b1   :  { %1948 = vst.msk [vmem:[%s3485_s6 + $0x88] sm:$0xff] %vm1930_vm2, %v1743_v35 }
 0x3b3   :  { %v2514_v36 = vpop.f32.mrb[84].mxu1 }
 0x3b4   :  { %v1764_v37 = vadd.f32 %v2514_v36, %v3157_v61  ;;  %v1755_v38 = vpop.f32.mrb[85].mxu1 }
 0x3b5   :  { %v1756_v39 = vadd.f32 %v3157_v61, %v1755_v38  ;;  %v2515_v54 = vpop.f32.mrb[86].mxu1 }
 0x3b6   :  { %1953 = vst.msk [vmem:[%s3485_s6 + $0xb0] sm:$0xff] %vm1930_vm2, %v1764_v37  ;;  %v1767_v41 = vadd.f32 %v2515_v54, %v3157_v61  ;;  %v1758_v42 = vpop.f32.mrb[87].mxu1 }
 0x3b7   :  { %1951 = vst.msk [vmem:[%s3485_s6 + $0xa0] sm:$0xff] %vm1930_vm2, %v1756_v39  ;;  %v1759_v43 = vadd.f32 %v3157_v61, %v1758_v42 }
 0x3b8   :  { %1954 = vst.msk [vmem:[%s3485_s6 + $0xb8] sm:$0xff] %vm1930_vm2, %v1767_v41 }
 0x3b9   :  { %1952 = vst.msk [vmem:[%s3485_s6 + $0xa8] sm:$0xff] %vm1930_vm2, %v1759_v43 }
 0x3bb   :  { %v2518_v44 = vpop.f32.mrb[88].mxu1 }
 0x3bc   :  { %v1780_v45 = vadd.f32 %v2518_v44, %v3157_v61  ;;  %v1771_v46 = vpop.f32.mrb[89].mxu1 }
 0x3bd   :  { %v1772_v47 = vadd.f32 %v3157_v61, %v1771_v46  ;;  %v2519_v48 = vpop.f32.mrb[90].mxu1 }
 0x3be   :  { %1957 = vst.msk [vmem:[%s3485_s6 + $0xd0] sm:$0xff] %vm1930_vm2, %v1780_v45  ;;  %v1783_v52 = vadd.f32 %v2519_v48, %v3157_v61  ;;  %v1774_v49 = vpop.f32.mrb[91].mxu1 }
 0x3bf   :  { %1955 = vst.msk [vmem:[%s3485_s6 + $0xc0] sm:$0xff] %vm1930_vm2, %v1772_v47  ;;  %v1775_v51 = vadd.f32 %v3157_v61, %v1774_v49 }
 0x3c0   :  { %1958 = vst.msk [vmem:[%s3485_s6 + $0xd8] sm:$0xff] %vm1930_vm2, %v1783_v52 }
 0x3c1   :  { %1956 = vst.msk [vmem:[%s3485_s6 + $0xc8] sm:$0xff] %vm1930_vm2, %v1775_v51 }
 0x3c3   :  { %v2522_v53 = vpop.f32.mrb[92].mxu1 }
 0x3c4   :  { %v1796_v55 = vadd.f32 %v2522_v53, %v3157_v61  ;;  %v1787_v56 = vpop.f32.mrb[93].mxu1 }
 0x3c5   :  { %v1788_v57 = vadd.f32 %v3157_v61, %v1787_v56  ;;  %v2523_v58 = vpop.f32.mrb[94].mxu1 }
 0x3c6   :  { %1961 = vst.msk [vmem:[%s3485_s6 + $0xf0] sm:$0xff] %vm1930_vm2, %v1796_v55  ;;  %v1799_v59 = vadd.f32 %v2523_v58, %v3157_v61  ;;  %v1790_v60 = vpop.f32.mrb[95].mxu1 }
 0x3c7   :  { %1959 = vst.msk [vmem:[%s3485_s6 + $0xe0] sm:$0xff] %vm1930_vm2, %v1788_v57  ;;  %v1791_v62 = vadd.f32 %v3157_v61, %v1790_v60 }
 0x3c8   :  { %1962 = vst.msk [vmem:[%s3485_s6 + $0xf8] sm:$0xff] %vm1930_vm2, %v1799_v59 }
 0x3c9   :  { %1960 = vst.msk [vmem:[%s3485_s6 + $0xe8] sm:$0xff] %vm1930_vm2, %v1791_v62 }
 0x3cb   :  { %v2526_v63 = vpop.f32.mrb[96].mxu1 }
 0x3cc   :  { %v1812_v0 = vadd.f32 %v2526_v63, %v3157_v61  ;;  %v1803_v25 = vpop.f32.mrb[97].mxu1 }
 0x3cd   :  { %v1804_v1 = vadd.f32 %v3157_v61, %v1803_v25  ;;  %v2527_v2 = vpop.f32.mrb[98].mxu1 }
 0x3ce   :  { %1965 = vst.msk [vmem:[%s3485_s6 + $0x110] sm:$0xff] %vm1930_vm2, %v1812_v0  ;;  %v1815_v3 = vadd.f32 %v2527_v2, %v3157_v61  ;;  %v1806_v4 = vpop.f32.mrb[99].mxu1 }
 0x3cf   :  { %1963 = vst.msk [vmem:[%s3485_s6 + $0x100] sm:$0xff] %vm1930_vm2, %v1804_v1  ;;  %v1807_v5 = vadd.f32 %v3157_v61, %v1806_v4 }
 0x3d0   :  { %1966 = vst.msk [vmem:[%s3485_s6 + $0x118] sm:$0xff] %vm1930_vm2, %v1815_v3 }
 0x3d1   :  { %1964 = vst.msk [vmem:[%s3485_s6 + $0x108] sm:$0xff] %vm1930_vm2, %v1807_v5 }
 0x3d3   :  { %v2530_v6 = vpop.f32.mrb[100].mxu1 }
 0x3d4   :  { %v1828_v7 = vadd.f32 %v2530_v6, %v3157_v61  ;;  %v1819_v8 = vpop.f32.mrb[101].mxu1 }
 0x3d5   :  { %v1820_v9 = vadd.f32 %v3157_v61, %v1819_v8  ;;  %v2531_v10 = vpop.f32.mrb[102].mxu1 }
 0x3d6   :  { %1969 = vst.msk [vmem:[%s3485_s6 + $0x130] sm:$0xff] %vm1930_vm2, %v1828_v7  ;;  %v1831_v11 = vadd.f32 %v2531_v10, %v3157_v61  ;;  %v1822_v12 = vpop.f32.mrb[103].mxu1 }
 0x3d7   :  { %1967 = vst.msk [vmem:[%s3485_s6 + $0x120] sm:$0xff] %vm1930_vm2, %v1820_v9  ;;  %v1823_v13 = vadd.f32 %v3157_v61, %v1822_v12 }
 0x3d8   :  { %1970 = vst.msk [vmem:[%s3485_s6 + $0x138] sm:$0xff] %vm1930_vm2, %v1831_v11 }
 0x3d9   :  { %1968 = vst.msk [vmem:[%s3485_s6 + $0x128] sm:$0xff] %vm1930_vm2, %v1823_v13 }
 0x3db   :  { %v2534_v14 = vpop.f32.mrb[104].mxu1 }
 0x3dc   :  { %v1844_v15 = vadd.f32 %v2534_v14, %v3157_v61  ;;  %v1835_v16 = vpop.f32.mrb[105].mxu1 }
 0x3dd   :  { %v1836_v17 = vadd.f32 %v3157_v61, %v1835_v16  ;;  %v2535_v18 = vpop.f32.mrb[106].mxu1 }
 0x3de   :  { %1973 = vst.msk [vmem:[%s3485_s6 + $0x150] sm:$0xff] %vm1930_vm2, %v1844_v15  ;;  %v1847_v19 = vadd.f32 %v2535_v18, %v3157_v61  ;;  %v1838_v20 = vpop.f32.mrb[107].mxu1 }
 0x3df   :  { %1971 = vst.msk [vmem:[%s3485_s6 + $0x140] sm:$0xff] %vm1930_vm2, %v1836_v17  ;;  %v1839_v21 = vadd.f32 %v3157_v61, %v1838_v20 }
 0x3e0   :  { %1974 = vst.msk [vmem:[%s3485_s6 + $0x158] sm:$0xff] %vm1930_vm2, %v1847_v19 }
 0x3e1   :  { %1972 = vst.msk [vmem:[%s3485_s6 + $0x148] sm:$0xff] %vm1930_vm2, %v1839_v21 }
 0x3e3   :  { %v2538_v22 = vpop.f32.mrb[108].mxu1 }
 0x3e4   :  { %v1860_v23 = vadd.f32 %v2538_v22, %v3157_v61  ;;  %v1851_v24 = vpop.f32.mrb[109].mxu1 }
 0x3e5   :  { %v1852_v26 = vadd.f32 %v3157_v61, %v1851_v24  ;;  %v2539_v27 = vpop.f32.mrb[110].mxu1 }
 0x3e6   :  { %1977 = vst.msk [vmem:[%s3485_s6 + $0x170] sm:$0xff] %vm1930_vm2, %v1860_v23  ;;  %v1863_v40 = vadd.f32 %v2539_v27, %v3157_v61  ;;  %v1854_v28 = vpop.f32.mrb[111].mxu1 }
 0x3e7   :  { %1975 = vst.msk [vmem:[%s3485_s6 + $0x160] sm:$0xff] %vm1930_vm2, %v1852_v26  ;;  %v1855_v29 = vadd.f32 %v3157_v61, %v1854_v28 }
 0x3e8   :  { %1978 = vst.msk [vmem:[%s3485_s6 + $0x178] sm:$0xff] %vm1930_vm2, %v1863_v40 }
 0x3e9   :  { %1976 = vst.msk [vmem:[%s3485_s6 + $0x168] sm:$0xff] %vm1930_vm2, %v1855_v29 }
 0x3eb   :  { %v2542_v30 = vpop.f32.mrb[112].mxu1 }
 0x3ec   :  { %v1876_v31 = vadd.f32 %v2542_v30, %v3157_v61  ;;  %v1867_v32 = vpop.f32.mrb[113].mxu1 }
 0x3ed   :  { %v1868_v33 = vadd.f32 %v3157_v61, %v1867_v32  ;;  %v2543_v50 = vpop.f32.mrb[114].mxu1 }
 0x3ee   :  { %1981 = vst.msk [vmem:[%s3485_s6 + $0x190] sm:$0xff] %vm1930_vm2, %v1876_v31  ;;  %v1879_v34 = vadd.f32 %v2543_v50, %v3157_v61  ;;  %v1870_v35 = vpop.f32.mrb[115].mxu1 }
 0x3ef   :  { %1979 = vst.msk [vmem:[%s3485_s6 + $0x180] sm:$0xff] %vm1930_vm2, %v1868_v33  ;;  %v1871_v36 = vadd.f32 %v3157_v61, %v1870_v35 }
 0x3f0   :  { %1982 = vst.msk [vmem:[%s3485_s6 + $0x198] sm:$0xff] %vm1930_vm2, %v1879_v34 }
 0x3f1   :  { %1980 = vst.msk [vmem:[%s3485_s6 + $0x188] sm:$0xff] %vm1930_vm2, %v1871_v36 }
 0x3f3   :  { %v2546_v37 = vpop.f32.mrb[116].mxu1 }
 0x3f4   :  { %v1892_v38 = vadd.f32 %v2546_v37, %v3157_v61  ;;  %v1883_v39 = vpop.f32.mrb[117].mxu1 }
 0x3f5   :  { %v1884_v54 = vadd.f32 %v3157_v61, %v1883_v39  ;;  %v2547_v41 = vpop.f32.mrb[118].mxu1 }
 0x3f6   :  { %1985 = vst.msk [vmem:[%s3485_s6 + $0x1b0] sm:$0xff] %vm1930_vm2, %v1892_v38  ;;  %v1895_v42 = vadd.f32 %v2547_v41, %v3157_v61  ;;  %v1886_v43 = vpop.f32.mrb[119].mxu1 }
 0x3f7   :  { %1983 = vst.msk [vmem:[%s3485_s6 + $0x1a0] sm:$0xff] %vm1930_vm2, %v1884_v54  ;;  %v1887_v44 = vadd.f32 %v3157_v61, %v1886_v43 }
 0x3f8   :  { %1986 = vst.msk [vmem:[%s3485_s6 + $0x1b8] sm:$0xff] %vm1930_vm2, %v1895_v42 }
 0x3f9   :  { %1984 = vst.msk [vmem:[%s3485_s6 + $0x1a8] sm:$0xff] %vm1930_vm2, %v1887_v44 }
 0x3fb   :  { %v2550_v45 = vpop.f32.mrb[120].mxu1 }
 0x3fc   :  { %v1908_v46 = vadd.f32 %v2550_v45, %v3157_v61  ;;  %v1899_v47 = vpop.f32.mrb[121].mxu1 }
 0x3fd   :  { %v1900_v48 = vadd.f32 %v3157_v61, %v1899_v47  ;;  %v2551_v52 = vpop.f32.mrb[122].mxu1 }
 0x3fe   :  { %1989 = vst.msk [vmem:[%s3485_s6 + $0x1d0] sm:$0xff] %vm1930_vm2, %v1908_v46  ;;  %v1911_v49 = vadd.f32 %v2551_v52, %v3157_v61  ;;  %v1902_v51 = vpop.f32.mrb[123].mxu1 }
 0x3ff   :  { %1987 = vst.msk [vmem:[%s3485_s6 + $0x1c0] sm:$0xff] %vm1930_vm2, %v1900_v48  ;;  %v1903_v53 = vadd.f32 %v3157_v61, %v1902_v51 }
 0x400   :  { %1990 = vst.msk [vmem:[%s3485_s6 + $0x1d8] sm:$0xff] %vm1930_vm2, %v1911_v49 }
 0x401   :  { %1988 = vst.msk [vmem:[%s3485_s6 + $0x1c8] sm:$0xff] %vm1930_vm2, %v1903_v53 }
 0x403   :  { %v2554_v55 = vpop.f32.mrb[124].mxu1 }
 0x404   :  { %v1924_v56 = vadd.f32 %v2554_v55, %v3157_v61  ;;  %v1915_v57 = vpop.f32.mrb[125].mxu1 }
 0x405   :  { %v1916_v58 = vadd.f32 %v3157_v61, %v1915_v57  ;;  %v2555_v59 = vpop.f32.mrb[126].mxu1 }
 0x406   :  { %1993 = vst.msk [vmem:[%s3485_s6 + $0x1f0] sm:$0xff] %vm1930_vm2, %v1924_v56  ;;  %v1927_v60 = vadd.f32 %v2555_v59, %v3157_v61  ;;  %v1918_v62 = vpop.f32.mrb[127].mxu1 }
 0x407   :  { %1991 = vst.msk [vmem:[%s3485_s6 + $0x1e0] sm:$0xff] %vm1930_vm2, %v1916_v58  ;;  %v1919_v63 = vadd.f32 %v3157_v61, %v1918_v62 }
 0x408   :  { %1994 = vst.msk [vmem:[%s3485_s6 + $0x1f8] sm:$0xff] %vm1930_vm2, %v1927_v60 }
 0x409   :  { %1992 = vst.msk [vmem:[%s3485_s6 + $0x1e8] sm:$0xff] %vm1930_vm2, %v1919_v63 }

</bundles_post_ra>
